<compile_context>
chip_gen: v5e
topology: v5e:2x2
jax: 0.10.0
libtpu: 0.0.40
codegen_flags: <defaults>
</compile_context>

<pallas_src>
import math

import jax
import jax.numpy as jnp
from jax.experimental import pallas as pl
from jax.experimental.pallas import tpu as pltpu


def _round_up(x: int, m: int) -> int:
    return ((x + m - 1) // m) * m


def _device_kind() -> str:
    try:
        return jax.devices()[0].device_kind.lower()
    except Exception:
        return ""


def _is_v5e() -> bool:
    k = _device_kind()
    return ("v5e" in k) or ("v5 lite" in k) or ("v5lite" in k)


def _vmem_capacity_bytes() -> int:
    try:
        return int(pltpu.get_tpu_info().vmem_capacity_bytes)
    except Exception:
        return 64 * 1024 * 1024  # conservative (v7x-sized) fallback


_NEG = -1e30  # finite "-inf" stand-in: avoids inf-inf NaNs on fully padded tiles


def _make_clip_loss_kernel(tb, tc, b_real, n_col, need_mask, txt_resident):
    """Kernel over a (row-block i, col-block j) grid of the (B, B) logits."""

    def kernel(img_ref, txt_ref, row_out_ref, colmax_ref, colsum_ref,
               m_ref, s_ref):
        i = pl.program_id(0)
        j = pl.program_id(1)

        @pl.when(j == 0)
        def _init():
            m_ref[...] = jnp.full_like(m_ref, _NEG)
            s_ref[...] = jnp.zeros_like(s_ref)

        if txt_resident:
            c0 = pl.multiple_of(j * tc, tc)
            txt_tile = txt_ref[pl.ds(c0, tc), :]            # (tc, d_pad)
        else:
            txt_tile = txt_ref[...]                          # (tc, d_pad)

        # One MXU matmul per tile; contract feature dims directly (no .T).
        dims = (((1,), (1,)), ((), ()))
        logits = jax.lax.dot_general(
            img_ref[...], txt_tile, dims,
            preferred_element_type=jnp.float32)              # (tb, tc) f32

        row_ok = None
        if need_mask:
            col_ok = (j * tc + jax.lax.broadcasted_iota(
                jnp.int32, (1, tc), 1)) < b_real             # (1, tc)
            row_ok = (i * tb + jax.lax.broadcasted_iota(
                jnp.int32, (tb, 1), 0)) < b_real             # (tb, 1)
            logits_r = jnp.where(col_ok, logits, _NEG)       # mask padded texts
            logits_c = jnp.where(row_ok, logits, _NEG)       # mask padded imgs
        else:
            logits_r = logits
            logits_c = logits

        # ---- images direction: online LSE across column tiles --------------
        t_max = jnp.max(logits_r, axis=1, keepdims=True)             # (tb, 1)
        new_m = jnp.maximum(m_ref[...], t_max)
        s_ref[...] = (s_ref[...] * jnp.exp(m_ref[...] - new_m)
                      + jnp.sum(jnp.exp(logits_r - new_m), axis=1,
                                keepdims=True))
        m_ref[...] = new_m

        # ---- texts direction: per-(row-block, column) partial stats --------
        m_c = jnp.max(logits_c, axis=0, keepdims=True)                # (1, tc)
        s_c = jnp.sum(jnp.exp(logits_c - m_c), axis=0, keepdims=True)
        colmax_ref[...] = m_c.reshape(1, 1, tc)
        colsum_ref[...] = s_c.reshape(1, 1, tc)

        # ---- finalize this row block ----------------------------------------
        @pl.when(j == n_col - 1)
        def _finalize():
            lse = m_ref[...] + jnp.log(s_ref[...])                    # (tb, 1)
            if need_mask:
                lse = jnp.where(row_ok, lse, 0.0)
            row_out_ref[...] = jnp.full((1, 1, 128), jnp.sum(lse),
                                        dtype=jnp.float32)

    return kernel


def clip_loss(image_features, text_features, logit_scale, temperature=None,
              row_tile=None, col_tile=None, matmul_dtype=jnp.bfloat16,
              force_txt_stream=False):
    """Pallas implementation of CLIPLoss.forward.

    Returns (total_loss, texts_loss, images_loss) as f32 scalars.
    """
    img = jnp.asarray(image_features, jnp.float32)
    txt = jnp.asarray(text_features, jnp.float32)
    B, D = img.shape
    assert txt.shape == (B, D), "image/text feature shapes must match"

    if temperature is None:
        # emulate self.logit_scale.data.clamp_(log(1), log(100)); exp(...)
        clamped = jnp.clip(jnp.asarray(logit_scale, jnp.float32),
                           math.log(1.0), math.log(100.0))
        temp = jnp.exp(clamped)
    else:
        temp = jnp.asarray(temperature, jnp.float32)

    v5e = _is_v5e()
    # MXU contraction depth: 128 on v5e, 256 on v6e/v7x.
    k_mult = 128 if v5e else 256
    d_pad = max(k_mult, _round_up(D, k_mult))

    # Tile sizes: tb matches the MXU M fill (128 on v5e, 256 on v6e/v7x);
    # tc bounds the f32 logits temporaries (constant in B).
    b128 = _round_up(B, 128)
    tb = row_tile if row_tile is not None else (128 if v5e else 256)
    tc = col_tile if col_tile is not None else 1024
    tb = min(tb, b128)
    tc = min(tc, b128)
    if tb % 8 != 0:
        raise ValueError(f"row_tile={tb} must be a multiple of 8")
    if tc % 128 != 0:
        raise ValueError(f"col_tile={tc} must be a multiple of 128")
    bp = _round_up(B, math.lcm(tb, tc))
    n_row, n_col = bp // tb, bp // tc
    need_mask = bp != B

    # Pad (zero rows/cols change no dot product), fold the temperature into the
    # image features, quantize to bf16 for the MXU -- one fused XLA pass.
    # TODO(synk): the temperature could instead be passed as an SMEM scalar and
    # applied to the f32 logits in-kernel to drop this wrapper pass entirely.
    img_p = jnp.pad(img, ((0, bp - B), (0, d_pad - D)))
    txt_p = jnp.pad(txt, ((0, bp - B), (0, d_pad - D)))
    img_q = (img_p * temp).astype(matmul_dtype)
    txt_q = txt_p.astype(matmul_dtype)

    # --- VMEM accounting (inputs are double-buffered by the pipeline) --------
    bs = jnp.dtype(matmul_dtype).itemsize
    img_bytes = 2 * tb * d_pad * bs
    txt_stream_bytes = 2 * tc * d_pad * bs
    txt_resident_bytes = 2 * bp * d_pad * bs
    tmp_bytes = 6 * tb * tc * 4                       # logits / exp temporaries
    out_bytes = 2 * (2 * tc * 4 + 128 * 4)
    scr_bytes = 2 * tb * 128 * 4                      # (tb,1) scratch, lane-padded
    base = img_bytes + tmp_bytes + out_bytes + scr_bytes

    vmem_cap = _vmem_capacity_bytes()
    # Keep text features resident in VMEM (fetched once) when they fit;
    # otherwise stream (tc, d_pad) blocks from HBM per tile.
    # TODO(synk): pipeline_mode=pl.Buffered(1) on the resident spec would halve
    # its footprint (a constant index_map needs no double buffer).
    txt_resident = (not force_txt_stream) and (
        base + txt_resident_bytes <= int(0.70 * vmem_cap))
    est_vmem = base + (txt_resident_bytes if txt_resident else txt_stream_bytes)
    vmem_limit = min(int(0.85 * vmem_cap),
                     max(int(1.5 * est_vmem), 32 * 1024 * 1024))

    if txt_resident:
        txt_spec = pl.BlockSpec((bp, d_pad), lambda i, j: (0, 0))
    else:
        txt_spec = pl.BlockSpec((tc, d_pad), lambda i, j: (j, 0))

    kernel = _make_clip_loss_kernel(tb, tc, B, n_col, need_mask, txt_resident)

    row_out, col_max, col_sum = pl.pallas_call(
        kernel,
        out_shape=(
            jax.ShapeDtypeStruct((n_row, 1, 128), jnp.float32),
            jax.ShapeDtypeStruct((n_row, 1, bp), jnp.float32),
            jax.ShapeDtypeStruct((n_row, 1, bp), jnp.float32),
        ),
        grid_spec=pltpu.PrefetchScalarGridSpec(
            num_scalar_prefetch=0,
            grid=(n_row, n_col),
            in_specs=[
                pl.BlockSpec((tb, d_pad), lambda i, j: (i, 0)),
                txt_spec,
            ],
            out_specs=[
                pl.BlockSpec((1, 1, 128), lambda i, j: (i, 0, 0)),
                pl.BlockSpec((1, 1, tc), lambda i, j: (i, 0, j)),
                pl.BlockSpec((1, 1, tc), lambda i, j: (i, 0, j)),
            ],
            scratch_shapes=[
                pltpu.VMEM((tb, 1), jnp.float32),   # running row max
                pltpu.VMEM((tb, 1), jnp.float32),   # running row sum-exp
            ],
        ),
        compiler_params=pltpu.CompilerParams(
            # Row-block axis is independent -> megacore-parallel on v7x;
            # column axis carries the online-LSE reduction -> arbitrary.
            dimension_semantics=("parallel", "arbitrary"),
            vmem_limit_bytes=vmem_limit,
        ),
    )(img_q, txt_q)

    # --- tiny O(n_row * B) finalization in plain JAX --------------------------
    sum_lse_rows = jnp.sum(row_out[:, 0, 0])                       # images dir

    cm = col_max[:, 0, :]                                           # (n_row, bp)
    cs = col_sum[:, 0, :]
    gmax = jnp.max(cm, axis=0)                                      # (bp,)
    col_lse = gmax + jnp.log(jnp.sum(cs * jnp.exp(cm - gmax), axis=0))
    sum_lse_cols = jnp.sum(col_lse[:B])                             # texts dir

    # Diagonal logits from the same quantized features the MXU consumed.
    diag = jnp.sum(img_q[:B].astype(jnp.float32)
                   * txt_q[:B].astype(jnp.float32), axis=1)
    diag_sum = jnp.sum(diag)

    inv_b = 1.0 / B
    images_loss = (sum_lse_rows - diag_sum) * inv_b
    texts_loss = (sum_lse_cols - diag_sum) * inv_b
    total_loss = 0.5 * (images_loss + texts_loss)
    return total_loss, texts_loss, images_loss


def _reference_clip_loss(image_features, text_features, logit_scale,
                         temperature=None, matmul_dtype=jnp.float32):
    """Pure-JAX reference mirroring the PyTorch module.

    matmul_dtype=bf16 reproduces the kernel's feature rounding (accumulation
    still f32) so the kernel can be checked with tight tolerances.
    """
    img = jnp.asarray(image_features, jnp.float32)
    txt = jnp.asarray(text_features, jnp.float32)
    if temperature is None:
        temp = jnp.exp(jnp.clip(jnp.asarray(logit_scale, jnp.float32),
                                math.log(1.0), math.log(100.0)))
    else:
        temp = jnp.asarray(temperature, jnp.float32)

    img_q = (img * temp).astype(matmul_dtype).astype(jnp.float32)
    txt_q = txt.astype(matmul_dtype).astype(jnp.float32)
    logits = img_q @ txt_q.T
    labels = jnp.arange(logits.shape[0])

    def ce(lg):
        lse = jax.nn.logsumexp(lg, axis=1)
        picked = lg[jnp.arange(lg.shape[0]), labels]
        return jnp.mean(lse - picked)

    images_loss = ce(logits)
    texts_loss = ce(logits.T)
    total = 0.5 * (images_loss + texts_loss)
    return total, texts_loss, images_loss


if __name__ == "__main__":
    # Case 1: batch NOT divisible by the tile (exercises pad + mask), feature
    # dim not a multiple of 128 (exercises D padding); 128x128 tiles give a
    # 2x2 grid so init / online-LSE / finalize paths all run.
    B, D = 200, 72
    key = jax.random.PRNGKey(0)
    k_img, k_txt = jax.random.split(key)
    image_features = jax.random.normal(k_img, (B, D), dtype=jnp.float32)
    text_features = jax.random.normal(k_txt, (B, D), dtype=jnp.float32)

    # deterministic parameter init, as in the module's __init__
    logit_scale = jnp.asarray(math.log(1.0 / 0.07), dtype=jnp.float32)

    out1 = clip_loss(image_features, text_features, logit_scale,
                     row_tile=128, col_tile=128)
    jax.block_until_ready(out1)

    m_ref1 = _reference_clip_loss(image_features, text_features, logit_scale,
                                  matmul_dtype=jnp.bfloat16)
    f_ref1 = _reference_clip_loss(image_features, text_features, logit_scale,
                                  matmul_dtype=jnp.float32)
    for got, want in zip(out1, m_ref1):   # matched bf16 rounding -> tight tol
        assert jnp.allclose(got, want, rtol=1e-3, atol=1e-3), (got, want)
    for got, want in zip(out1, f_ref1):   # full-f32 PyTorch semantics -> loose
        assert jnp.allclose(got, want, rtol=5e-2, atol=5e-2), (got, want)

    # Case 1b: same problem through the HBM-streamed text-feature path.
    out1s = clip_loss(image_features, text_features, logit_scale,
                      row_tile=128, col_tile=128, force_txt_stream=True)
    jax.block_until_ready(out1s)
    for got, want in zip(out1s, m_ref1):
        assert jnp.allclose(got, want, rtol=1e-3, atol=1e-3), (got, want)

    # Case 2: divisible batch, default (generation-aware) tiles, no masking.
    B2, D2 = 128, 64
    k_img2, k_txt2 = jax.random.split(jax.random.PRNGKey(0))
    img2 = jax.random.normal(k_img2, (B2, D2), dtype=jnp.float32)
    txt2 = jax.random.normal(k_txt2, (B2, D2), dtype=jnp.float32)
    out2 = clip_loss(img2, txt2, logit_scale)
    jax.block_until_ready(out2)
    m_ref2 = _reference_clip_loss(img2, txt2, logit_scale,
                                  matmul_dtype=jnp.bfloat16)
    f_ref2 = _reference_clip_loss(img2, txt2, logit_scale,
                                  matmul_dtype=jnp.float32)
    for got, want in zip(out2, m_ref2):
        assert jnp.allclose(got, want, rtol=1e-3, atol=1e-3), (got, want)
    for got, want in zip(out2, f_ref2):
        assert jnp.allclose(got, want, rtol=5e-2, atol=5e-2), (got, want)

    print("KERNEL_OK")
</pallas_src>

<mosaic_0001>
module attributes {stable_mosaic.version = 11 : i64} {
  func.func @kernel(%arg0: i32, %arg1: i32, %arg2: memref<128x256xbf16, #tpu.memory_space<vmem>>, %arg3: memref<256x256xbf16, #tpu.memory_space<vmem>>, %arg4: memref<1x1x128xf32, #tpu.memory_space<vmem>>, %arg5: memref<1x1x128xf32, #tpu.memory_space<vmem>>, %arg6: memref<1x1x128xf32, #tpu.memory_space<vmem>>, %arg7: memref<128x1xf32, #tpu.memory_space<vmem>>, %arg8: memref<128x1xf32, #tpu.memory_space<vmem>>) attributes {dimension_semantics = [#tpu.dimension_semantics<parallel>, #tpu.dimension_semantics<arbitrary>], iteration_bounds = array<i64: 2, 2>, scalar_prefetch = 0 : i64, scratch_operands = 2 : i64, tpu.core_type = #tpu.core_type<tc>, window_params = [{transform_indices = @transform_0, window_bounds = array<i64: 128, 256>}, {pipeline_mode = #tpu.pipeline_mode<synchronous>, transform_indices = @transform_1, window_bounds = array<i64: 256, 256>}, {transform_indices = @transform_2, window_bounds = array<i64: 1, 1, 128>}, {transform_indices = @transform_3, window_bounds = array<i64: 1, 1, 128>}, {transform_indices = @transform_4, window_bounds = array<i64: 1, 1, 128>}]} {
    %c0_i32 = arith.constant 0 : i32
    %0 = arith.cmpi eq, %arg1, %c0_i32 : i32
    %1 = arith.extui %0 : i1 to i32
    %c0_i32_0 = arith.constant 0 : i32
    %2 = arith.cmpi ne, %1, %c0_i32_0 : i32
    scf.if %2 {
      %cst_29 = arith.constant -1.000000e+30 : f32
      %60 = vector.broadcast %cst_29 : f32 to vector<128x1xf32>
      %c0_30 = arith.constant 0 : index
      %c0_31 = arith.constant 0 : index
      %61 = vector.load %arg7[%c0_30, %c0_31] : memref<128x1xf32, #tpu.memory_space<vmem>>, vector<128x1xf32>
      tpu.vector_store %arg7[%c0_30, %c0_31], %60 {strides = array<i32>} : memref<128x1xf32, #tpu.memory_space<vmem>>, vector<128x1xf32>,
      %cst_32 = arith.constant 0.000000e+00 : f32
      %62 = vector.broadcast %cst_32 : f32 to vector<128x1xf32>
      %c0_33 = arith.constant 0 : index
      %c0_34 = arith.constant 0 : index
      %63 = vector.load %arg8[%c0_33, %c0_34] : memref<128x1xf32, #tpu.memory_space<vmem>>, vector<128x1xf32>
      tpu.vector_store %arg8[%c0_33, %c0_34], %62 {strides = array<i32>} : memref<128x1xf32, #tpu.memory_space<vmem>>, vector<128x1xf32>,
    } else {
    }
    %c128_i32 = arith.constant 128 : i32
    %3 = arith.muli %arg1, %c128_i32 : i32
    %4 = tpu.assume_multiple %3, 128 : i32
    %5 = arith.index_cast %4 : i32 to index
    %c0 = arith.constant 0 : index
    %6 = vector.load %arg3[%5, %c0] : memref<256x256xbf16, #tpu.memory_space<vmem>>, vector<128x256xbf16>
    %c0_1 = arith.constant 0 : index
    %c0_2 = arith.constant 0 : index
    %7 = vector.load %arg2[%c0_1, %c0_2] : memref<128x256xbf16, #tpu.memory_space<vmem>>, vector<128x256xbf16>
    %cst = arith.constant dense<0.000000e+00> : vector<128x128xf32>
    %8 = tpu.matmul %7, %6, %cst {dimension_numbers = #tpu.dot_dimension_numbers<[1], [1], [0], [0], [0, 0, 1, 0], [], []>} : vector<128x256xbf16>, vector<128x256xbf16>, vector<128x128xf32> -> vector<128x128xf32>
    %c128_i32_3 = arith.constant 128 : i32
    %9 = arith.muli %arg1, %c128_i32_3 : i32
    %10 = tpu.iota {dimensions = array<i32: 1>} : vector<1x128xi32>
    %11 = vector.broadcast %9 : i32 to vector<1x128xi32>
    %12 = arith.addi %11, %10 : vector<1x128xi32>
    %c200_i32 = arith.constant 200 : i32
    %13 = vector.broadcast %c200_i32 : i32 to vector<1x128xi32>
    %14 = arith.cmpi slt, %12, %13 : vector<1x128xi32>
    %c128_i32_4 = arith.constant 128 : i32
    %15 = arith.muli %arg0, %c128_i32_4 : i32
    %16 = tpu.iota {dimensions = array<i32: 0>} : vector<128x1xi32>
    %17 = vector.broadcast %15 : i32 to vector<128x1xi32>
    %18 = arith.addi %17, %16 : vector<128x1xi32>
    %c200_i32_5 = arith.constant 200 : i32
    %19 = vector.broadcast %c200_i32_5 : i32 to vector<128x1xi32>
    %20 = arith.cmpi slt, %18, %19 : vector<128x1xi32>
    %cst_6 = arith.constant -1.000000e+30 : f32
    %21 = vector.shape_cast %14 : vector<1x128xi1> to vector<1x128xi1>
    %22 = vector.broadcast %21 : vector<1x128xi1> to vector<128x128xi1>
    %23 = vector.broadcast %cst_6 : f32 to vector<128x128xf32>
    %24 = arith.select %22, %8, %23 : vector<128x128xi1>, vector<128x128xf32>
    %cst_7 = arith.constant -1.000000e+30 : f32
    %25 = vector.shape_cast %20 : vector<128x1xi1> to vector<128x1xi1>
    %26 = vector.broadcast %25 : vector<128x1xi1> to vector<128x128xi1>
    %27 = vector.broadcast %cst_7 : f32 to vector<128x128xf32>
    %28 = arith.select %26, %8, %27 : vector<128x128xi1>, vector<128x128xf32>
    %cst_8 = arith.constant dense<0xFF800000> : vector<128xf32>
    %29 = vector.multi_reduction <maximumf>, %24, %cst_8 [1] : vector<128x128xf32> to vector<128xf32>
    %30 = vector.shape_cast %29 : vector<128xf32> to vector<128x1xf32>
    %c0_9 = arith.constant 0 : index
    %c0_10 = arith.constant 0 : index
    %31 = vector.load %arg7[%c0_9, %c0_10] : memref<128x1xf32, #tpu.memory_space<vmem>>, vector<128x1xf32>
    %32 = arith.maximumf %31, %30 : vector<128x1xf32>
    %c0_11 = arith.constant 0 : index
    %c0_12 = arith.constant 0 : index
    %33 = vector.load %arg8[%c0_11, %c0_12] : memref<128x1xf32, #tpu.memory_space<vmem>>, vector<128x1xf32>
    %c0_13 = arith.constant 0 : index
    %c0_14 = arith.constant 0 : index
    %34 = vector.load %arg7[%c0_13, %c0_14] : memref<128x1xf32, #tpu.memory_space<vmem>>, vector<128x1xf32>
    %35 = arith.subf %34, %32 : vector<128x1xf32>
    %36 = math.exp %35 : vector<128x1xf32>
    %37 = arith.mulf %33, %36 : vector<128x1xf32>
    %38 = vector.broadcast %32 : vector<128x1xf32> to vector<128x128xf32>
    %39 = arith.subf %24, %38 : vector<128x128xf32>
    %40 = math.exp %39 : vector<128x128xf32>
    %cst_15 = arith.constant dense<0.000000e+00> : vector<128xf32>
    %41 = vector.multi_reduction <add>, %40, %cst_15 [1] : vector<128x128xf32> to vector<128xf32>
    %42 = vector.shape_cast %41 : vector<128xf32> to vector<128x1xf32>
    %43 = arith.addf %37, %42 : vector<128x1xf32>
    %c0_16 = arith.constant 0 : index
    %c0_17 = arith.constant 0 : index
    %44 = vector.load %arg8[%c0_16, %c0_17] : memref<128x1xf32, #tpu.memory_space<vmem>>, vector<128x1xf32>
    tpu.vector_store %arg8[%c0_16, %c0_17], %43 {strides = array<i32>} : memref<128x1xf32, #tpu.memory_space<vmem>>, vector<128x1xf32>,
    %c0_18 = arith.constant 0 : index
    %c0_19 = arith.constant 0 : index
    %45 = vector.load %arg7[%c0_18, %c0_19] : memref<128x1xf32, #tpu.memory_space<vmem>>, vector<128x1xf32>
    tpu.vector_store %arg7[%c0_18, %c0_19], %32 {strides = array<i32>} : memref<128x1xf32, #tpu.memory_space<vmem>>, vector<128x1xf32>,
    %cst_20 = arith.constant dense<0xFF800000> : vector<128xf32>
    %46 = vector.multi_reduction <maximumf>, %28, %cst_20 [0] : vector<128x128xf32> to vector<128xf32>
    %47 = vector.shape_cast %46 : vector<128xf32> to vector<1x128xf32>
    %48 = vector.broadcast %47 : vector<1x128xf32> to vector<128x128xf32>
    %49 = arith.subf %28, %48 : vector<128x128xf32>
    %50 = math.exp %49 : vector<128x128xf32>
    %cst_21 = arith.constant dense<0.000000e+00> : vector<128xf32>
    %51 = vector.multi_reduction <add>, %50, %cst_21 [0] : vector<128x128xf32> to vector<128xf32>
    %52 = vector.shape_cast %51 : vector<128xf32> to vector<1x128xf32>
    %53 = vector.shape_cast %47 : vector<1x128xf32> to vector<1x1x128xf32>
    %c0_22 = arith.constant 0 : index
    %c0_23 = arith.constant 0 : index
    %c0_24 = arith.constant 0 : index
    %54 = vector.load %arg5[%c0_22, %c0_23, %c0_24] : memref<1x1x128xf32, #tpu.memory_space<vmem>>, vector<1x1x128xf32>
    tpu.vector_store %arg5[%c0_22, %c0_23, %c0_24], %53 {strides = array<i32>} : memref<1x1x128xf32, #tpu.memory_space<vmem>>, vector<1x1x128xf32>,
    %55 = vector.shape_cast %52 : vector<1x128xf32> to vector<1x1x128xf32>
    %c0_25 = arith.constant 0 : index
    %c0_26 = arith.constant 0 : index
    %c0_27 = arith.constant 0 : index
    %56 = vector.load %arg6[%c0_25, %c0_26, %c0_27] : memref<1x1x128xf32, #tpu.memory_space<vmem>>, vector<1x1x128xf32>
    tpu.vector_store %arg6[%c0_25, %c0_26, %c0_27], %55 {strides = array<i32>} : memref<1x1x128xf32, #tpu.memory_space<vmem>>, vector<1x1x128xf32>,
    %c1_i32 = arith.constant 1 : i32
    %57 = arith.cmpi eq, %arg1, %c1_i32 : i32
    %58 = arith.extui %57 : i1 to i32
    %c0_i32_28 = arith.constant 0 : i32
    %59 = arith.cmpi ne, %58, %c0_i32_28 : i32
    scf.if %59 {
      %c0_29 = arith.constant 0 : index
      %c0_30 = arith.constant 0 : index
      %60 = vector.load %arg7[%c0_29, %c0_30] : memref<128x1xf32, #tpu.memory_space<vmem>>, vector<128x1xf32>
      %c0_31 = arith.constant 0 : index
      %c0_32 = arith.constant 0 : index
      %61 = vector.load %arg8[%c0_31, %c0_32] : memref<128x1xf32, #tpu.memory_space<vmem>>, vector<128x1xf32>
      %62 = math.log %61 : vector<128x1xf32>
      %63 = arith.addf %60, %62 : vector<128x1xf32>
      %cst_33 = arith.constant 0.000000e+00 : f32
      %64 = vector.broadcast %cst_33 : f32 to vector<128x1xf32>
      %65 = arith.select %20, %63, %64 : vector<128x1xi1>, vector<128x1xf32>
      %66 = vector.shape_cast %65 : vector<128x1xf32> to vector<1x128x1xf32>
      %cst_34 = arith.constant dense<0.000000e+00> : vector<1xf32>
      %67 = vector.multi_reduction <add>, %66, %cst_34 [1, 2] : vector<1x128x1xf32> to vector<1xf32>
      %68 = vector.shape_cast %67 : vector<1xf32> to vector<1x1x1xf32>
      %69 = vector.extract %68[0, 0, 0] : f32 from vector<1x1x1xf32>
      %70 = vector.broadcast %69 : f32 to vector<1x1x128xf32>
      %c0_35 = arith.constant 0 : index
      %c0_36 = arith.constant 0 : index
      %c0_37 = arith.constant 0 : index
      %71 = vector.load %arg4[%c0_35, %c0_36, %c0_37] : memref<1x1x128xf32, #tpu.memory_space<vmem>>, vector<1x1x128xf32>
      tpu.vector_store %arg4[%c0_35, %c0_36, %c0_37], %70 {strides = array<i32>} : memref<1x1x128xf32, #tpu.memory_space<vmem>>, vector<1x1x128xf32>,
    } else {
    }
    return
  }
  func.func @transform_0(%arg0: i32, %arg1: i32) -> (i32, i32) {
    %c0_i32 = arith.constant 0 : i32
    %c0_i32_0 = arith.constant 0 : i32
    return %arg0, %c0_i32 : i32, i32
  }
  func.func @transform_1(%arg0: i32, %arg1: i32) -> (i32, i32) {
    %c0_i32 = arith.constant 0 : i32
    %c0_i32_0 = arith.constant 0 : i32
    %c0_i32_1 = arith.constant 0 : i32
    return %c0_i32, %c0_i32_0 : i32, i32
  }
  func.func @transform_2(%arg0: i32, %arg1: i32) -> (i32, i32, i32) {
    %c0_i32 = arith.constant 0 : i32
    %c0_i32_0 = arith.constant 0 : i32
    %c0_i32_1 = arith.constant 0 : i32
    return %arg0, %c0_i32, %c0_i32_0 : i32, i32, i32
  }
  func.func @transform_3(%arg0: i32, %arg1: i32) -> (i32, i32, i32) {
    %c0_i32 = arith.constant 0 : i32
    %c0_i32_0 = arith.constant 0 : i32
    return %arg0, %c0_i32, %arg1 : i32, i32, i32
  }
  func.func @transform_4(%arg0: i32, %arg1: i32) -> (i32, i32, i32) {
    %c0_i32 = arith.constant 0 : i32
    %c0_i32_0 = arith.constant 0 : i32
    return %arg0, %c0_i32, %arg1 : i32, i32, i32
  }
}

</mosaic_0001>

<bundles_post_ra>
// kernel: tpu_custom_call.1
= control target key start
LH: loop header
LB: loop body
LE: loop exit
PB: predicated region body
PF: predicated region fallthrough
CT: control target
= control target key end

     0   :  { %s3223_s0 = inlined_call_operand.hbm [shape: bf16[256,256], index: 0, kind: input, shape index: {}]   ;;  %s3224_s1 = inlined_call_operand.hbm [shape: bf16[256,256], index: 1, kind: input, shape index: {}]   ;;  %s3225_s2 = inlined_call_operand.hbm [shape: f32[2,1,128], index: 2, kind: output, shape index: {0}]   ;;  %s3226_s3 = inlined_call_operand.hbm [shape: f32[2,1,256], index: 3, kind: output, shape index: {1}]   ;;  %s3227_s4 = inlined_call_operand.hbm [shape: f32[2,1,256], index: 4, kind: output, shape index: {2}]  }
   0x1   :  { %3258 = sst [smem:[#allocation38_spill]] %s3223_s0 }
   0x2   :  { %3259 = sst [smem:[#allocation39_spill]] %s3224_s1 }
   0x3   :  { %3260 = sst [smem:[#allocation40_spill]] %s3225_s2 }
   0x4   :  { %3261 = sst [smem:[#allocation41_spill]] %s3226_s3 }
   0x5   :  { %3262 = sst [smem:[#allocation42_spill]] %s3227_s4 }
   0x6   :  { %10 = vsyncpa [#allocation5], 0 }
   0x7   :  { %12 = vsyncpa [#allocation5 + $0x1], 0 }
   0x8   :  { %13 = vsyncpa [#allocation8], 0 }
   0x9   :  { %14 = vsyncpa [#allocation6], 0 }
   0xa   :  { %16 = vsyncpa [#allocation6 + $0x1], 0 }
   0xb   :  { %17 = vsyncpa [#allocation11], 0 }
   0xc   :  { %19 = vsyncpa [#allocation11 + $0x1], 0  ;;  %s2248_s15 = smov 0   ;;  %s2250_s16 = smov 0  }
   0xd   :  { %s2252_s17 = smov 0   ;;  %s2254_s18 = smov 0  }
   0xe   :  { %s2256_s19 = smov 0   ;;  %s2258_s20 = smov 0  }
   0xf   :  { %s2260_s21 = smov 0   ;;  %s2262_s22 = smov 0  }
  0x10   :  { %s2264_s23 = smov 0   ;;  %s2266_s24 = smov 0  }
  0x11   :  { %s2268_s25 = smov 0  }
  0x12 LB: > { %3263 = sst [smem:[#allocation17_spill]] %s2187_s18  ;;  %s2302_s26 = sadd.s32 4294967295, %s2215_s25   ;;  %s2215_s25 = sphi %s2268_s25, %s25_s25   ;;  %s2211_s24 = sphi %s2266_s24, %s3344_s24   ;;  %s2207_s23 = sphi %s2264_s23, %s3335_s23   ;;  %s2203_s22 = sphi %s2262_s22, %s3343_s22   ;;  %s2199_s21 = sphi %s2260_s21, %s3334_s21   ;;  %s2195_s20 = sphi %s2258_s20, %s3342_s20   ;;  %s2191_s19 = sphi %s2256_s19, %s3341_s19   ;;  %s2187_s18 = sphi %s2254_s18, %s3340_s18   ;;  %s2183_s17 = sphi %s2252_s17, %s3339_s17   ;;  %s2179_s16 = sphi %s2250_s16, %s3338_s16   ;;  %s2175_s15 = sphi %s2248_s15, %s3337_s15  }
  0x13   : > { %3264 = sst [smem:[#allocation18_spill]] %s2207_s23  ;;  %s3228_s27 = sadd.s32 4294967294, %s2215_s25  }
  0x14   : > { %p57_p0 = scmp.ne.s32.totalorder %s2191_s19, %s2187_s18  ;;  %p58_p1 = scmp.eq.s32.totalorder %s2302_s26, 0 }
  0x15   : > { %p102_p2 = scmp.eq.s32.totalorder %s2302_s26, 3  ;;  %p108_p3 = scmp.eq.s32.totalorder %s3228_s27, 3 }
  0x16   : > { %p2313_p4 = por %p58_p1, %p57_p0  ;;  %p129_p5 = scmp.ne.s32.totalorder %s2183_s17, %s2179_s16 }
  0x17   : > { %p2319_p6 = por %p108_p3, %p57_p0  ;;  %p135_p7 = scmp.ne.s32.totalorder %s2179_s16, %s2175_s15 }
  0x18   : > { %p2326_p8 = por %p129_p5, %p102_p2  ;;  %p1509_p9 = scmp.ge.s32.totalorder %s2215_s25, 1 }
  0x19   : > { %s3266_s29 = scalar_select %p2319_p6, 1, 0 }
  0x1a   : > { %p2331_p10 = por %p135_p7, %p108_p3  ;;  %p171_p11 = scmp.lt.s32.totalorder %s2215_s25, 5 }
  0x1b   : > { %3267 = sst [smem:[#allocation19_spill]] %s3266_s29  ;;  %s2217_s10 = smov [#allocation7]  }
  0x1c   : > { %s3269_s5 = scalar_select %p2331_p10, 1, 0 }
  0x1d   : > { %s3271_s1 = sld [smem:[#allocation39_spill]]  ;;  %p2339_p12 = pnand %p1509_p9, %p171_p11 }
  0x1e   : > { %3270 = sst [smem:[#allocation20_spill]] %s3269_s5  ;;  %s184_s11 = sshll.u32 %s2217_s10, 4  ;;  %s185_s11 = int_to_ptr.vmem [resolvable:$true] %s184_s11 }
  0x1f   : > { %p1722_p13 = pneg %p2339_p12  ;;  %s3229_s12 = smov 128  }
  0x20   : > { %s3230_s13 = smov 8   ;;  %s34_s14 = sadd.s32 1, %s2207_s23 }
  0x21   : > { %p1723_p0 = pnand %p1722_p13, %p58_p1  ;;  %p35_p3 = scmp.ge.s32.totalorder %s34_s14, 2 }
  0x22   : > { %s37_s15 = sadd.s32 1, %s2211_s24  ;;  %s44_s6 = sadd.s32 1, %s2195_s20 }
  0x23   : > { %s182_s8 = sshll.u32 %s3271_s1, 4  ;;  %p51_p5 = scmp.ne.s32.totalorder %s2195_s20, %s2191_s19  ;;  %s183_s8 = int_to_ptr.hbm [resolvable:$true] %s182_s8 }
  0x24   : > { %1725 = dma.hbm_to_vmem [thread:$0]  (!%p1723_p0), %s183_s8, 4096, %s185_s11, [#allocation8], %s3229_s12, %s3229_s12, %s3230_s13  }
  0x25   : > { %s3346_s14 = smov (%p35_p3, %s34_s14), 0  ;;  %s3348_s15 = smov (!%p35_p3, %s37_s15), %s2211_s24 }
  0x26   : > { %3273 = sst [smem:[#allocation21_spill]] %s3346_s14  ;;  %p52_p7 = scmp.eq.s32.totalorder %s2215_s25, 0 }
  0x27   : > { %p2361_p9 = por %p102_p2, %p51_p5  ;;  %p39_p11 = scmp.ge.s32.totalorder %s3348_s15, 2 }
  0x28   : > { %s115_s8 = ssub.s32 %s2207_s23, %s3346_s14  ;;  %p2367_p13 = por %p52_p7, %p51_p5 }
  0x29   : > { %s3274_s7 = scalar_select %p2361_p9, 1, 0 }
  0x2a   : > { %s119_s11 = sadd.s32 1, %s2183_s17  ;;  %s3350_s15 = smov (%p39_p11, %s3348_s15), 0 }
  0x2b   : > { %3275 = sst [smem:[#allocation22_spill]] %s3274_s7  ;;  %p1741_p0 = scmp.lt.s32.totalorder %s2215_s25, 4 }
  0x2c   : > { %3277 = sst [smem:[#allocation23_spill]] %s3350_s15  ;;  %s198_s27 = sand.u32 1, %s2195_s20  }
  0x2d   : > { %s41_s12 = ssub.s32 %s2211_s24, %s3350_s15  ;;  %s1512_s1 = sshll.u32 %s198_s27, 7 }
  0x2e   : > { %p42_p3 = scmp.eq.s32.totalorder %s41_s12, 0  ;;  %s116_s13 = sor.u32 %s115_s8, %s41_s12 }
  0x2f   : > { %p117_p2 = scmp.eq.s32.totalorder %s116_s13, 0  ;;  %s1658_s23 = sshll.u32 %s2211_s24, 7 }
  0x30   : > { %s2379_s5 = scalar_select %p42_p3, %s2195_s20, %s44_s6  }
  0x31   : > { %s2382_s14 = scalar_select %p117_p2, %s2183_s17, %s119_s11  }
  0x32   : > { %s3278_s0 = sld [smem:[#allocation38_spill]]  ;;  %s202_s2 = scalar_lea.vmem [#allocation4], %s1512_s1 }
  0x33   : > { %s211_s7 = sshll.u32 %s202_s2, 4  ;;  %p1727_p5 = pnand %p1741_p0, %p2367_p13  ;;  %s212_s7 = int_to_ptr.vmem [resolvable:$true] %s211_s7 }
  0x34   : > { %s199_s12 = scalar_lea.sflag [#allocation5], %s198_s27  ;;  %s3279_s13 = smov 8  }
  0x35   : > { %s3280_s8 = smov 128  }
  0x36   : > { %223 = sbr.rel (%p2339_p12) target bundleno = 1010 (0x3f2), region = 28 }
  0x38   : > { %s208_s4 = scalar_lea.hbm %s3278_s0, %s1658_s23 }
  0x39   : > { %s209_s3 = sshll.u32 %s208_s4, 4  ;;  %s210_s3 = int_to_ptr.hbm [resolvable:$true] %s209_s3 }
  0x3a   : > { %1729 = dma.hbm_to_vmem [thread:$0]  (!%p1727_p5), %s210_s3, 2048, %s212_s7, %s199_s12, %s3280_s8, %s3280_s8, %s3279_s13  }
  0x3b   : > { %s2398_s18 = sand.u32 1, %s2191_s19  }
  0x3c   : > { %s1517_s1 = sshll.u32 %s2398_s18, 7  ;;  %s226_s2 = scalar_lea.sflag [#allocation5], %s2398_s18 }
  0x3d   : > { %s2402_s4 = scalar_lea.vmem [#allocation4], %s1517_s1 }
  0x3e   : > { %2158 = dma.done.wait (%p2313_p4), %s226_s2, 2048  }
  0x3f   : > { %2160 = vsyncadd (%p2313_p4), %s226_s2, 4294965248 }
  0x40   : > { %2162 = dma.done.wait (%p58_p1), [#allocation8], 4096  }
  0x41   : > { %2164 = vsyncadd (%p58_p1), [#allocation8], 4294963200  ;;  %s259_s3 = sand.u32 1, %s2179_s16   ;;  %s254_s23 = scalar_lea.vmem [#allocation9], %s2398_s18 }
  0x42   : > { %s2414_s27 = scalar_lea.vmem [#allocation10], %s259_s3  ;;  %s2416_s29 = scalar_lea.vmem [#allocation12], %s259_s3 }
  0x43   : > { %p1519_p12 = scmp.ne.s32.totalorder %s2199_s21, 0 }
  0x45   : > { %271 = sbr.rel (%p1519_p12) target bundleno = 107 (0x6b), region = 40 }
  0x4a   : > { %vm272_vm0 = vcmask 7168   ;;  %v2220_v0 = vmov -1e+30   ;;  %v2221_v1 = vmov 0.0  }
  0x4b   : > { %273 = vst.msk [vmem:[#allocation2] sm:$0xff] %vm272_vm0, %v2220_v0 }
  0x4c   : > { %274 = vst.msk [vmem:[#allocation2 + $0x8] sm:$0xff] %vm272_vm0, %v2220_v0 }
  0x4d   : > { %275 = vst.msk [vmem:[#allocation2 + $0x10] sm:$0xff] %vm272_vm0, %v2220_v0 }
  0x4e   : > { %276 = vst.msk [vmem:[#allocation2 + $0x18] sm:$0xff] %vm272_vm0, %v2220_v0 }
  0x4f   : > { %277 = vst.msk [vmem:[#allocation2 + $0x20] sm:$0xff] %vm272_vm0, %v2220_v0 }
  0x50   : > { %278 = vst.msk [vmem:[#allocation2 + $0x28] sm:$0xff] %vm272_vm0, %v2220_v0 }
  0x51   : > { %279 = vst.msk [vmem:[#allocation2 + $0x30] sm:$0xff] %vm272_vm0, %v2220_v0 }
  0x52   : > { %280 = vst.msk [vmem:[#allocation2 + $0x38] sm:$0xff] %vm272_vm0, %v2220_v0 }
  0x53   : > { %281 = vst.msk [vmem:[#allocation2 + $0x40] sm:$0xff] %vm272_vm0, %v2220_v0 }
  0x54   : > { %282 = vst.msk [vmem:[#allocation2 + $0x48] sm:$0xff] %vm272_vm0, %v2220_v0 }
  0x55   : > { %283 = vst.msk [vmem:[#allocation2 + $0x50] sm:$0xff] %vm272_vm0, %v2220_v0 }
  0x56   : > { %284 = vst.msk [vmem:[#allocation2 + $0x58] sm:$0xff] %vm272_vm0, %v2220_v0 }
  0x57   : > { %285 = vst.msk [vmem:[#allocation2 + $0x60] sm:$0xff] %vm272_vm0, %v2220_v0 }
  0x58   : > { %286 = vst.msk [vmem:[#allocation2 + $0x68] sm:$0xff] %vm272_vm0, %v2220_v0 }
  0x59   : > { %287 = vst.msk [vmem:[#allocation2 + $0x70] sm:$0xff] %vm272_vm0, %v2220_v0 }
  0x5a   : > { %288 = vst.msk [vmem:[#allocation2 + $0x78] sm:$0xff] %vm272_vm0, %v2220_v0 }
  0x5b   : > { %289 = vst.msk [vmem:[#allocation3] sm:$0xff] %vm272_vm0, %v2221_v1 }
  0x5c   : > { %290 = vst.msk [vmem:[#allocation3 + $0x8] sm:$0xff] %vm272_vm0, %v2221_v1 }
  0x5d   : > { %291 = vst.msk [vmem:[#allocation3 + $0x10] sm:$0xff] %vm272_vm0, %v2221_v1 }
  0x5e   : > { %292 = vst.msk [vmem:[#allocation3 + $0x18] sm:$0xff] %vm272_vm0, %v2221_v1 }
  0x5f   : > { %293 = vst.msk [vmem:[#allocation3 + $0x20] sm:$0xff] %vm272_vm0, %v2221_v1 }
  0x60   : > { %294 = vst.msk [vmem:[#allocation3 + $0x28] sm:$0xff] %vm272_vm0, %v2221_v1 }
  0x61   : > { %295 = vst.msk [vmem:[#allocation3 + $0x30] sm:$0xff] %vm272_vm0, %v2221_v1 }
  0x62   : > { %296 = vst.msk [vmem:[#allocation3 + $0x38] sm:$0xff] %vm272_vm0, %v2221_v1 }
  0x63   : > { %297 = vst.msk [vmem:[#allocation3 + $0x40] sm:$0xff] %vm272_vm0, %v2221_v1 }
  0x64   : > { %298 = vst.msk [vmem:[#allocation3 + $0x48] sm:$0xff] %vm272_vm0, %v2221_v1 }
  0x65   : > { %299 = vst.msk [vmem:[#allocation3 + $0x50] sm:$0xff] %vm272_vm0, %v2221_v1 }
  0x66   : > { %300 = vst.msk [vmem:[#allocation3 + $0x58] sm:$0xff] %vm272_vm0, %v2221_v1 }
  0x67   : > { %301 = vst.msk [vmem:[#allocation3 + $0x60] sm:$0xff] %vm272_vm0, %v2221_v1 }
  0x68   : > { %302 = vst.msk [vmem:[#allocation3 + $0x68] sm:$0xff] %vm272_vm0, %v2221_v1 }
  0x69   : > { %303 = vst.msk [vmem:[#allocation3 + $0x70] sm:$0xff] %vm272_vm0, %v2221_v1 }
  0x6a   : > { %304 = vst.msk [vmem:[#allocation3 + $0x78] sm:$0xff] %vm272_vm0, %v2221_v1 }
  0x6b PF: > { %s1520_s28 = sshll.u32 %s2199_s21, 7  ;;  %v1525_v50 = vld [vmem:[%s2402_s4] sm:$0xf]  ;;  %v1677_v51 = vld [vmem:[%s2402_s4 + $0x4] sm:$0xf0]  ;;  %s1651_s6 = sshll.u32 %s2203_s22, 7 }
  0x6c   : > { %s2454_s9 = scalar_lea.vmem [#allocation7], %s1520_s28  ;;  %v1557_v52 = vld [vmem:[%s2402_s4 + $0x40] sm:$0xf]  ;;  %v1685_v53 = vld [vmem:[%s2402_s4 + $0x44] sm:$0xf0]  ;;  %v1526_v58 = vor.u32 %v1677_v51, %v1525_v50  ;;  %p1652_p1 = scmp.ne.s32.totalorder %s2199_s21, 1 }
  0x6d   : > { %v1645_v2 = vld [vmem:[%s2454_s9 + $0x70] sm:$0xf]  ;;  %v1675_v3 = vld [vmem:[%s2454_s9 + $0x74] sm:$0xf0]  ;;  %v1674_v4 = vld [vmem:[%s2454_s9 + $0x74] sm:$0xf]  ;;  %v1558_v59 = vor.u32 %v1685_v53, %v1557_v52 }
  0x6e   : > { %v1646_v5 = vor.u32 %v1675_v3, %v1645_v2  ;;  %v1647_v6 = vld [vmem:[%s2454_s9 + $0x78] sm:$0xf0]  ;;  %v1637_v8 = vld [vmem:[%s2454_s9 + $0x60] sm:$0xf]  ;;  %v1673_v9 = vld [vmem:[%s2454_s9 + $0x64] sm:$0xf0] }
  0x6f   : > { %v1650_v7 = vor.u32 %v1674_v4, %v1647_v6  ;;  %v1672_v10 = vld [vmem:[%s2454_s9 + $0x64] sm:$0xf]  ;;  %v1639_v11 = vld [vmem:[%s2454_s9 + $0x68] sm:$0xf0]  ;;  %v1638_v12 = vor.u32 %v1673_v9, %v1637_v8  ;;  %v1629_v14 = vld [vmem:[%s2454_s9 + $0x50] sm:$0xf] }
  0x70   : > { %503 = vmatpush.bf16.xpose.msra.mxu0 %v1646_v5  ;;  %1692 = vmatpush.bf16.xpose.msra.mxu2 %v1646_v5  ;;  %v1642_v13 = vor.u32 %v1672_v10, %v1639_v11  ;;  %v1671_v15 = vld [vmem:[%s2454_s9 + $0x54] sm:$0xf0]  ;;  %v1670_v16 = vld [vmem:[%s2454_s9 + $0x54] sm:$0xf]  ;;  %v1631_v17 = vld [vmem:[%s2454_s9 + $0x58] sm:$0xf0] }
  0x71   : > { %552 = vmatpush.bf16.xpose.msra.mxu1 %v1650_v7  ;;  %1700 = vmatpush.bf16.xpose.msra.mxu3 %v1650_v7  ;;  %v1630_v18 = vor.u32 %v1671_v15, %v1629_v14  ;;  %v1634_v19 = vor.u32 %v1670_v16, %v1631_v17  ;;  %v1621_v20 = vld [vmem:[%s2454_s9 + $0x40] sm:$0xf]  ;;  %v1669_v21 = vld [vmem:[%s2454_s9 + $0x44] sm:$0xf0]  ;;  %v1668_v22 = vld [vmem:[%s2454_s9 + $0x44] sm:$0xf] }
  0x72   : > { %v1623_v23 = vld [vmem:[%s2454_s9 + $0x48] sm:$0xf0]  ;;  %v1622_v24 = vor.u32 %v1669_v21, %v1621_v20  ;;  %v1613_v26 = vld [vmem:[%s2454_s9 + $0x30] sm:$0xf]  ;;  %v1667_v27 = vld [vmem:[%s2454_s9 + $0x34] sm:$0xf0] }
  0x73   : > { %v1626_v25 = vor.u32 %v1668_v22, %v1623_v23  ;;  %v1666_v28 = vld [vmem:[%s2454_s9 + $0x34] sm:$0xf]  ;;  %v1615_v29 = vld [vmem:[%s2454_s9 + $0x38] sm:$0xf0]  ;;  %v1614_v30 = vor.u32 %v1667_v27, %v1613_v26  ;;  %v1605_v32 = vld [vmem:[%s2454_s9 + $0x20] sm:$0xf] }
  0x74   : > { %v1618_v31 = vor.u32 %v1666_v28, %v1615_v29  ;;  %v1665_v33 = vld [vmem:[%s2454_s9 + $0x24] sm:$0xf0]  ;;  %v1664_v34 = vld [vmem:[%s2454_s9 + $0x24] sm:$0xf]  ;;  %v1607_v35 = vld [vmem:[%s2454_s9 + $0x28] sm:$0xf0] }
  0x75   : > { %v1606_v36 = vor.u32 %v1665_v33, %v1605_v32  ;;  %v1610_v37 = vor.u32 %v1664_v34, %v1607_v35  ;;  %v1597_v38 = vld [vmem:[%s2454_s9 + $0x10] sm:$0xf]  ;;  %v1663_v39 = vld [vmem:[%s2454_s9 + $0x14] sm:$0xf0]  ;;  %v1662_v40 = vld [vmem:[%s2454_s9 + $0x14] sm:$0xf]  ;;  %v601_v34 = vlaneseq }
  0x76   : > { %v1599_v41 = vld [vmem:[%s2454_s9 + $0x18] sm:$0xf0]  ;;  %v1598_v42 = vor.u32 %v1663_v39, %v1597_v38  ;;  %v1589_v44 = vld [vmem:[%s2454_s9] sm:$0xf]  ;;  %v1661_v45 = vld [vmem:[%s2454_s9 + $0x4] sm:$0xf0] }
  0x77   : > { %v1602_v43 = vor.u32 %v1662_v40, %v1599_v41  ;;  %v1660_v46 = vld [vmem:[%s2454_s9 + $0x4] sm:$0xf]  ;;  %v1591_v47 = vld [vmem:[%s2454_s9 + $0x8] sm:$0xf0]  ;;  %v1590_v48 = vor.u32 %v1661_v45, %v1589_v44  ;;  %v1533_v62 = vld [vmem:[%s2402_s4 + $0x10] sm:$0xf] }
  0x78   : > { %504 = vmatpush.bf16.xpose.msra.mxu0 %v1638_v12  ;;  %1693 = vmatpush.bf16.xpose.msra.mxu2 %v1638_v12  ;;  %v1594_v49 = vor.u32 %v1660_v46, %v1591_v47  ;;  %v1676_v54 = vld [vmem:[%s2402_s4 + $0x4] sm:$0xf]  ;;  %v1527_v55 = vld [vmem:[%s2402_s4 + $0x8] sm:$0xf0]  ;;  %v1679_v63 = vld [vmem:[%s2402_s4 + $0x14] sm:$0xf0] }
  0x79   : > { %553 = vmatpush.bf16.xpose.msra.mxu1 %v1642_v13  ;;  %1701 = vmatpush.bf16.xpose.msra.mxu3 %v1642_v13  ;;  %v1684_v56 = vld [vmem:[%s2402_s4 + $0x44] sm:$0xf]  ;;  %v1559_v57 = vld [vmem:[%s2402_s4 + $0x48] sm:$0xf0]  ;;  %v1530_v60 = vor.u32 %v1676_v54, %v1527_v55  ;;  %v1565_v0 = vld [vmem:[%s2402_s4 + $0x50] sm:$0xf]  ;;  %v1534_v6 = vor.u32 %v1679_v63, %v1533_v62 }
  0x7a   : > { %v1562_v61 = vor.u32 %v1684_v56, %v1559_v57  ;;  %v1687_v1 = vld [vmem:[%s2402_s4 + $0x54] sm:$0xf0]  ;;  %v1678_v2 = vld [vmem:[%s2402_s4 + $0x14] sm:$0xf]  ;;  %v1535_v3 = vld [vmem:[%s2402_s4 + $0x18] sm:$0xf0] }
  0x7b   : > { %v1686_v4 = vld [vmem:[%s2402_s4 + $0x54] sm:$0xf]  ;;  %v1567_v5 = vld [vmem:[%s2402_s4 + $0x58] sm:$0xf0]  ;;  %v1566_v7 = vor.u32 %v1687_v1, %v1565_v0  ;;  %v1538_v8 = vor.u32 %v1678_v2, %v1535_v3  ;;  %v1541_v10 = vld [vmem:[%s2402_s4 + $0x20] sm:$0xf] }
  0x7c   : > { %v1570_v9 = vor.u32 %v1686_v4, %v1567_v5  ;;  %v1681_v11 = vld [vmem:[%s2402_s4 + $0x24] sm:$0xf0]  ;;  %v1573_v12 = vld [vmem:[%s2402_s4 + $0x60] sm:$0xf]  ;;  %v1680_v14 = vld [vmem:[%s2402_s4 + $0x24] sm:$0xf] }
  0x7d   : > { %v1689_v13 = vld [vmem:[%s2402_s4 + $0x64] sm:$0xf0]  ;;  %v1543_v15 = vld [vmem:[%s2402_s4 + $0x28] sm:$0xf0]  ;;  %v1688_v16 = vld [vmem:[%s2402_s4 + $0x64] sm:$0xf] }
  0x7e   : > { %v1575_v17 = vld [vmem:[%s2402_s4 + $0x68] sm:$0xf0]  ;;  %v1546_v20 = vor.u32 %v1680_v14, %v1543_v15  ;;  %v1549_v22 = vld [vmem:[%s2402_s4 + $0x30] sm:$0xf]  ;;  %v1683_v23 = vld [vmem:[%s2402_s4 + $0x34] sm:$0xf0] }
  0x7f   : > { %v1578_v21 = vor.u32 %v1688_v16, %v1575_v17  ;;  %v1682_v26 = vld [vmem:[%s2402_s4 + $0x34] sm:$0xf]  ;;  %v1551_v27 = vld [vmem:[%s2402_s4 + $0x38] sm:$0xf0]  ;;  %v602_v35 = vand.u32 127, %v601_v34  ;;  %v2606_v17 = vstv %s1651_s6 }
  0x80   : > { %505 = vmatpush.bf16.xpose.msra.mxu0 %v1630_v18  ;;  %1694 = vmatpush.bf16.xpose.msra.mxu2 %v1630_v18  ;;  %v1542_v18 = vor.u32 %v1681_v11, %v1541_v10  ;;  %v1690_v28 = vld [vmem:[%s2402_s4 + $0x74] sm:$0xf]  ;;  %v1583_v29 = vld [vmem:[%s2402_s4 + $0x78] sm:$0xf0]  ;;  %v1554_v32 = vor.u32 %v1682_v26, %v1551_v27  ;;  %v2591_v10 = vshrl.u32 %v601_v34, 7 }
  0x81   : > { %554 = vmatpush.bf16.xpose.msra.mxu1 %v1634_v19  ;;  %1702 = vmatpush.bf16.xpose.msra.mxu3 %v1634_v19  ;;  %v1574_v19 = vor.u32 %v1689_v13, %v1573_v12  ;;  %v1586_v33 = vor.u32 %v1690_v28, %v1583_v29 }
  0x88   : > { %506 = vmatpush.bf16.xpose.msra.mxu0 %v1622_v24  ;;  %1695 = vmatpush.bf16.xpose.msra.mxu2 %v1622_v24  ;;  %v1581_v24 = vld [vmem:[%s2402_s4 + $0x70] sm:$0xf] }
  0x89   : > { %555 = vmatpush.bf16.xpose.msra.mxu1 %v1626_v25  ;;  %1703 = vmatpush.bf16.xpose.msra.mxu3 %v1626_v25  ;;  %v1691_v25 = vld [vmem:[%s2402_s4 + $0x74] sm:$0xf0] }
  0x90   : > { %507 = vmatpush.bf16.xpose.msra.mxu0 %v1614_v30  ;;  %1696 = vmatpush.bf16.xpose.msra.mxu2 %v1614_v30  ;;  %v1550_v30 = vor.u32 %v1683_v23, %v1549_v22  ;;  %v618_v22 = vadd.s32 80, %v2591_v10  ;;  %v613_v23 = vadd.s32 40, %v2591_v10 }
  0x91   : > { %556 = vmatpush.bf16.xpose.msra.mxu1 %v1618_v31  ;;  %1704 = vmatpush.bf16.xpose.msra.mxu3 %v1618_v31  ;;  %v1582_v31 = vor.u32 %v1691_v25, %v1581_v24  ;;  %v2618_v24 = vadd.s32 %v2606_v17, %v2591_v10  ;;  %v611_v25 = vadd.s32 24, %v2591_v10 }
  0x93   : > { %vm641_vm2 = vcmp.lt.s32.totalorder %v2618_v24, 200 }
  0x98   : > { %508 = vmatpush.bf16.xpose.msra.mxu0 %v1606_v36  ;;  %1697 = vmatpush.bf16.xpose.msra.mxu2 %v1606_v36  ;;  %v603_v36 = vstv %s1520_s28 }
  0x99   : > { %557 = vmatpush.bf16.xpose.msra.mxu1 %v1610_v37  ;;  %1705 = vmatpush.bf16.xpose.msra.mxu3 %v1610_v37  ;;  %v2522_v37 = vadd.s32 %v603_v36, %v602_v35  ;;  %v619_v35 = vadd.s32 88, %v2591_v10 }
  0x9b   : > { %vm605_vm1 = vcmp.lt.s32.totalorder %v2522_v37, 200 }
  0xa0   : > { %509 = vmatpush.bf16.xpose.msra.mxu0 %v1598_v42  ;;  %1698 = vmatpush.bf16.xpose.msra.mxu2 %v1598_v42 }
  0xa1   : > { %558 = vmatpush.bf16.xpose.msra.mxu1 %v1602_v43  ;;  %1706 = vmatpush.bf16.xpose.msra.mxu3 %v1602_v43 }
  0xa8   : > { %510 = vmatpush.bf16.xpose.msra.mxu0 %v1590_v48  ;;  %1699 = vmatpush.bf16.xpose.msra.mxu2 %v1590_v48 }
  0xa9   : > { %559 = vmatpush.bf16.xpose.msra.mxu1 %v1594_v49  ;;  %1707 = vmatpush.bf16.xpose.msra.mxu3 %v1594_v49 }
  0xaf   : > { %511 = vmatmul.bf16.vlgmr.msra.gmra.mxu0 %v1526_v58  ;;  %531 = vmatmul.bf16.vlgmr.msra.gmra.mxu2 %v1558_v59 }
  0xb0   : > { %560 = vmatmul.bf16.vlgmr.msra.gmra.mxu1 %v1530_v60  ;;  %580 = vmatmul.bf16.vlgmr.msra.gmra.mxu3 %v1562_v61 }
  0xbf   : > { %516 = vmatmul.bf16.gmra.mxu0 %v1534_v6  ;;  %536 = vmatmul.bf16.gmra.mxu2 %v1566_v7 }
  0xc0   : > { %565 = vmatmul.bf16.gmra.mxu1 %v1538_v8  ;;  %585 = vmatmul.bf16.gmra.mxu3 %v1570_v9 }
  0xcf   : > { %521 = vmatmul.bf16.gmra.mxu0 %v1542_v18  ;;  %541 = vmatmul.bf16.gmra.mxu2 %v1574_v19  ;;  %v616_v18 = vadd.s32 64, %v2591_v10  ;;  %v609_v19 = vadd.s32 8, %v2591_v10 }
  0xd0   : > { %570 = vmatmul.bf16.gmra.mxu1 %v1546_v20  ;;  %590 = vmatmul.bf16.gmra.mxu3 %v1578_v21  ;;  %v617_v20 = vadd.s32 72, %v2591_v10  ;;  %v610_v21 = vadd.s32 16, %v2591_v10 }
  0xd1   : > { %v2622_v28 = vadd.s32 %v2606_v17, %v616_v18  ;;  %v2625_v29 = vadd.s32 %v2606_v17, %v609_v19 }
  0xd2   : > { %v2633_v34 = vadd.s32 %v2606_v17, %v610_v21 }
  0xd3   : > { %3281 = vst [vmem:[#allocation24_spill] sm:$0xff] %v2622_v28  ;;  %vm649_vm3 = vcmp.lt.s32.totalorder %v2622_v28, 200  ;;  %vm642_vm4 = vcmp.lt.s32.totalorder %v2625_v29, 200 }
  0xd4   : > { %3283 = vst [vmem:[#allocation26_spill] sm:$0xff] %v2633_v34  ;;  %vm643_vm7 = vcmp.lt.s32.totalorder %v2633_v34, 200 }
  0xdf   : > { %526 = vmatmul.bf16.gmra.mxu0 %v1550_v30  ;;  %546 = vmatmul.bf16.gmra.mxu2 %v1582_v31  ;;  %v612_v30 = vadd.s32 32, %v2591_v10 }
  0xe0   : > { %575 = vmatmul.bf16.gmra.mxu1 %v1554_v32  ;;  %595 = vmatmul.bf16.gmra.mxu3 %v1586_v33  ;;  %v614_v32 = vadd.s32 48, %v2591_v10  ;;  %v2630_v33 = vadd.s32 %v2606_v17, %v617_v20 }
  0xe2   : > { %3282 = vst [vmem:[#allocation25_spill] sm:$0xff] %v2630_v33  ;;  %vm3241_vm6 = vcmp.lt.s32.totalorder %v2630_v33, 200 }
 0x12c   : > { %v512_v38 = vpop.f32.mrf.mxu0 }
 0x12d   : > { %v561_v39 = vpop.f32.mrf.mxu1 }
 0x12e   : > { %v2525_v40 = vadd.f32 %v561_v39, %v512_v38  ;;  %v2639_v39 = vadd.s32 %v2606_v17, %v618_v22 }
 0x130   : > { %v2530_v41 = vsel %vm605_vm1, %v2525_v40, -1e+30  ;;  %3284 = vst [vmem:[#allocation27_spill] sm:$0xff] %v2639_v39  ;;  %vm651_vm8 = vcmp.lt.s32.totalorder %v2639_v39, 200  ;;  %v2699_v18 = vsel %vm641_vm2, %v2525_v40, -1e+30 }
 0x131   : > { %723 = vmax.xlane.f32.xlu0 %v2530_v41 }
 0x132   : > { %v532_v42 = vpop.f32.mrf.mxu2 }
 0x133   : > { %v581_v43 = vpop.f32.mrf.mxu3 }
 0x134   : > { %v2533_v44 = vadd.f32 %v581_v43, %v532_v42  ;;  %v514_v45 = vpop.f32.mrf.mxu0  ;;  %v620_v42 = vadd.s32 96, %v2591_v10  ;;  %v2643_v43 = vadd.s32 %v2606_v17, %v613_v23 }
 0x135   : > { %v563_v46 = vpop.f32.mrf.mxu1 }
 0x136   : > { %v2535_v47 = vadd.f32 %v563_v46, %v514_v45  ;;  %v2540_v48 = vsel %vm605_vm1, %v2533_v44, -1e+30  ;;  %3285 = vst [vmem:[#allocation28_spill] sm:$0xff] %v2643_v43  ;;  %v615_v46 = vadd.s32 56, %v2591_v10  ;;  %vm646_vm5 = vcmp.lt.s32.totalorder %v2643_v43, 200 }
 0x137   : > { %739 = vmax.xlane.f32.xlu2 %v2540_v48 }
 0x138   : > { %v2546_v49 = vsel %vm605_vm1, %v2535_v47, -1e+30  ;;  %v708_v22 = vsel %vm642_vm4, %v2535_v47, -1e+30 }
 0x139   : > { %725 = vmax.xlane.f32.xlu0 %v2546_v49 }
 0x13a   : > { %v534_v50 = vpop.f32.mrf.mxu2 }
 0x13b   : > { %v583_v51 = vpop.f32.mrf.mxu3 }
 0x13c   : > { %v2549_v52 = vadd.f32 %v583_v51, %v534_v50  ;;  %v517_v53 = vpop.f32.mrf.mxu0  ;;  %v2647_v50 = vadd.s32 %v2606_v17, %v611_v25 }
 0x13d   : > { %v566_v54 = vpop.f32.mrf.mxu1 }
 0x13e   : > { %v2551_v55 = vadd.f32 %v566_v54, %v517_v53  ;;  %v2561_v57 = vsel %vm605_vm1, %v2549_v52, -1e+30  ;;  %3286 = vst [vmem:[#allocation29_spill] sm:$0xff] %v2647_v50  ;;  %vm644_vm9 = vcmp.lt.s32.totalorder %v2647_v50, 200 }
 0x140   : > { %v2556_v56 = vsel %vm605_vm1, %v2551_v55, -1e+30 }
 0x141   : > { %727 = vmax.xlane.f32.xlu1 %v2556_v56  ;;  %741 = vmax.xlane.f32.xlu0 %v2561_v57 }
 0x142   : > { %v537_v58 = vpop.f32.mrf.mxu2 }
 0x143   : > { %v586_v59 = vpop.f32.mrf.mxu3 }
 0x144   : > { %v2565_v60 = vadd.f32 %v586_v59, %v537_v58  ;;  %v519_v61 = vpop.f32.mrf.mxu0  ;;  %v2660_v58 = vadd.s32 %v2606_v17, %v612_v30  ;;  %v621_v59 = vadd.s32 104, %v2591_v10 }
 0x145   : > { %v568_v62 = vpop.f32.mrf.mxu1 }
 0x146   : > { %v2570_v63 = vsel %vm605_vm1, %v2565_v60, -1e+30  ;;  %v2573_v2 = vadd.f32 %v568_v62, %v519_v61  ;;  %3287 = vst [vmem:[#allocation30_spill] sm:$0xff] %v2660_v58  ;;  %v2664_v61 = vadd.s32 %v2606_v17, %v614_v32  ;;  %v2671_v62 = vadd.s32 %v2606_v17, %v619_v35 }
 0x147   : > { %vm645_vm10 = vcmp.lt.s32.totalorder %v2660_v58, 200 }
 0x148   : > { %v2586_v7 = vsel %vm605_vm1, %v2573_v2, -1e+30  ;;  %3288 = vst [vmem:[#allocation31_spill] sm:$0xff] %v2664_v61  ;;  %vm647_vm11 = vcmp.lt.s32.totalorder %v2664_v61, 200  ;;  %vm652_vm12 = vcmp.lt.s32.totalorder %v2671_v62, 200 }
 0x149   : > { %743 = vmax.xlane.f32.xlu1 %v2570_v63  ;;  %3289 = vst [vmem:[#allocation32_spill] sm:$0xff] %v2671_v62 }
 0x14a   : > { %v539_v0 = vpop.f32.mrf.mxu2 }
 0x14b   : > { %v588_v1 = vpop.f32.mrf.mxu3 }
 0x14c   : > { %v2575_v3 = vadd.f32 %v588_v1, %v539_v0  ;;  %v522_v4 = vpop.f32.mrf.mxu0  ;;  %v2678_v1 = vadd.s32 %v2606_v17, %v620_v42 }
 0x14d   : > { %v571_v5 = vpop.f32.mrf.mxu1 }
 0x14e   : > { %v2580_v6 = vsel %vm605_vm1, %v2575_v3, -1e+30  ;;  %v2589_v8 = vadd.f32 %v571_v5, %v522_v4  ;;  %3290 = vst [vmem:[#allocation33_spill] sm:$0xff] %v2678_v1  ;;  %v622_v4 = vadd.s32 112, %v2591_v10  ;;  %v2684_v5 = vadd.s32 %v2606_v17, %v615_v46 }
 0x14f   : > { %745 = vmax.xlane.f32.xlu2 %v2580_v6  ;;  %vm653_vm13 = vcmp.lt.s32.totalorder %v2678_v1, 200  ;;  %v715_v46 = vsel %vm649_vm3, %v2533_v44, -1e+30 }
 0x150   : > { %v2599_v14 = vsel %vm605_vm1, %v2589_v8, -1e+30  ;;  %3291 = vst [vmem:[#allocation34_spill] sm:$0xff] %v2684_v5  ;;  %vm648_vm14 = vcmp.lt.s32.totalorder %v2684_v5, 200  ;;  %v2717_v40 = vsel %vm645_vm10, %v2589_v8, -1e+30 }
 0x151   : > { %729 = vmax.xlane.f32.xlu1 %v2586_v7  ;;  %v1076_v35 = vmax.f32 %v2699_v18, %v2717_v40 }
 0x152   : > { %v542_v9 = vpop.f32.mrf.mxu2 }
 0x153   : > { %v591_v11 = vpop.f32.mrf.mxu3 }
 0x154   : > { %v2594_v12 = vadd.f32 %v591_v11, %v542_v9  ;;  %v524_v13 = vpop.f32.mrf.mxu0  ;;  %v2692_v11 = vadd.s32 %v2606_v17, %v621_v59 }
 0x155   : > { %v573_v15 = vpop.f32.mrf.mxu1 }
 0x156   : > { %v2604_v16 = vsel %vm605_vm1, %v2594_v12, -1e+30  ;;  %v574_v26 = vadd.f32 %v573_v15, %v524_v13  ;;  %3292 = vst [vmem:[#allocation35_spill] sm:$0xff] %v2692_v11  ;;  %v623_v15 = vadd.s32 120, %v2591_v10  ;;  %v2711_v10 = vadd.s32 %v2606_v17, %v622_v4 }
 0x157   : > { %731 = vmax.xlane.f32.xlu2 %v2599_v14  ;;  %747 = vmax.xlane.f32.xlu0 %v2604_v16  ;;  %vm654_vm15 = vcmp.lt.s32.totalorder %v2692_v11, 200 }
 0x158   : > { %v2651_v53 = vsel %vm605_vm1, %v574_v26, -1e+30  ;;  %v2704_v19 = vsel %vm646_vm5, %v574_v26, -1e+30  ;;  %3293 = vst [vmem:[#allocation36_spill] sm:$0xff] %v2711_v10  ;;  %v2734_v8 = vadd.s32 %v2606_v17, %v623_v15  ;;  %vm655_vm0 = vcmp.lt.s32.totalorder %v2711_v10, 200 }
 0x159   : > { %v1077_v30 = vmax.f32 %v708_v22, %v2704_v19 }
 0x15a   : > { %v544_v27 = vpop.f32.mrf.mxu2  ;;  %3294 = vst [vmem:[#allocation37_spill] sm:$0xff] %v2734_v8 }
 0x15b   : > { %v593_v31 = vpop.f32.mrf.mxu3 }
 0x15c   : > { %v2636_v36 = vadd.f32 %v593_v31, %v544_v27  ;;  %v527_v38 = vpop.f32.mrf.mxu0  ;;  %v709_v27 = vsel %vm643_vm7, %v2551_v55, -1e+30  ;;  %v710_v31 = vsel %vm644_vm9, %v2573_v2, -1e+30  ;;  %v2756_v2 = vsel %vm3241_vm6, %v2549_v52, -1e+30 }
 0x15d   : > { %v576_v45 = vpop.f32.mrf.mxu1  ;;  %v1081_v59 = vmax.f32 %v1077_v30, %v2756_v2  ;;  %vm656_vm6 = vcmp.lt.s32.totalorder %v2734_v8, 200  ;;  %v2776_v52 = vsel %vm652_vm12, %v2575_v3, -1e+30 }
 0x15e   : > { %v577_v51 = vadd.f32 %v576_v45, %v527_v38  ;;  %v2656_v54 = vsel %vm605_vm1, %v2636_v36, -1e+30  ;;  %v2761_v42 = vsel %vm654_vm15, %v2636_v36, -1e+30  ;;  %v2781_v36 = vsel %vm653_vm13, %v2594_v12, -1e+30 }
 0x15f   : > { %733 = vmax.xlane.f32.xlu2 %v2651_v53  ;;  %749 = vmax.xlane.f32.xlu1 %v2656_v54 }
 0x160   : > { %v2675_v0 = vsel %vm605_vm1, %v577_v51, -1e+30  ;;  %v2721_v25 = vsel %vm647_vm11, %v577_v51, -1e+30  ;;  %v2769_v51 = vsel %vm651_vm8, %v2565_v60, -1e+30 }
 0x161   : > { %735 = vmax.xlane.f32.xlu0 %v2675_v0  ;;  %v1078_v38 = vmax.f32 %v709_v27, %v2721_v25 }
 0x162   : > { %v547_v9 = vpop.f32.mrf.mxu2 }
 0x163   : > { %v596_v13 = vpop.f32.mrf.mxu3  ;;  %v1082_v15 = vmax.f32 %v1078_v38, %v2769_v51 }
 0x164   : > { %v597_v20 = vadd.f32 %v596_v13, %v547_v9  ;;  %v529_v21 = vpop.f32.mrf.mxu0  ;;  %v1080_v9 = vmax.f32 %v1076_v35, %v715_v46  ;;  %v1085_v13 = vmax.f32 %v1081_v59, %v2761_v42 }
 0x165   : > { %v578_v23 = vpop.f32.mrf.mxu1 }
 0x166   : > { %v579_v26 = vadd.f32 %v578_v23, %v529_v21  ;;  %v2725_v47 = vsel %vm605_vm1, %v597_v20, -1e+30  ;;  %v2785_v44 = vsel %vm655_vm0, %v597_v20, -1e+30  ;;  %v1084_v20 = vmax.f32 %v1080_v9, %v2781_v36 }
 0x167   : > { %751 = vmax.xlane.f32.xlu2 %v2725_v47  ;;  %v1086_v23 = vmax.f32 %v1082_v15, %v2785_v44 }
 0x168   : > { %v2741_v32 = vsel %vm648_vm14, %v579_v26, -1e+30  ;;  %v2745_v55 = vsel %vm605_vm1, %v579_v26, -1e+30  ;;  %v1088_v30 = vmax.f32 %v1084_v20, %v1085_v13 }
 0x169   : > { %v1079_v17 = vmax.f32 %v710_v31, %v2741_v32  ;;  %737 = vmax.xlane.f32.xlu1 %v2745_v55 }
 0x16a   : > { %v549_v45 = vpop.f32.mrf.mxu2 }
 0x16b   : > { %v598_v4 = vpop.f32.mrf.mxu3  ;;  %v1083_v21 = vmax.f32 %v1079_v17, %v2776_v52 }
 0x16c   : > { %v599_v60 = vadd.f32 %v598_v4, %v549_v45 }
 0x16e   : > { %v2792_v3 = vsel %vm656_vm6, %v599_v60, -1e+30  ;;  %v2796_v12 = vsel %vm605_vm1, %v599_v60, -1e+30  ;;  %vm1043_vm1 = vcmask 7168  }
 0x16f   : > { %v1087_v26 = vmax.f32 %v1083_v21, %v2792_v3  ;;  %753 = vmax.xlane.f32.xlu0 %v2796_v12 }
 0x171   : > { %v1089_v35 = vmax.f32 %v1086_v23, %v1087_v26 }
 0x173   : > { %v1090_v38 = vmax.f32 %v1088_v30, %v1089_v35 }
 0x175   : > { %v1091_v17 = vrot.slane %v1090_v38, 4 }
 0x177   : > { %v1092_v45 = vmax.f32 %v1090_v38, %v1091_v17 }
 0x179   : > { %v1093_v59 = vrot.slane %v1092_v45, 2 }
 0x17b   : > { %v1094_v4 = vmax.f32 %v1092_v45, %v1093_v59 }
 0x17d   : > { %v1095_v8 = vrot.slane %v1094_v4, 1 }
 0x17f   : > { %v2802_v37 = vmax.f32 %v1094_v4, %v1095_v8 }
 0x181   : > { %v1097_v60 = vsub.f32 %v2699_v18, %v2802_v37  ;;  %v1098_v9 = vsub.f32 %v708_v22, %v2802_v37  ;;  %1166 = vst [vmem:[%s2414_s27] sm:$0x1] %v2802_v37  ;;  %v1099_v15 = vsub.f32 %v709_v27, %v2802_v37  ;;  %v1100_v13 = vsub.f32 %v710_v31, %v2802_v37 }
 0x182   : > { %v1101_v23 = vsub.f32 %v2717_v40, %v2802_v37  ;;  %v1102_v8 = vsub.f32 %v2704_v19, %v2802_v37  ;;  %v1103_v22 = vsub.f32 %v2721_v25, %v2802_v37  ;;  %v1104_v27 = vsub.f32 %v2741_v32, %v2802_v37 }
 0x183   : > { %v1113_v21 = vmul.f32 1.442695, %v1097_v60  ;;  %v1115_v20 = vmul.f32 1.442695, %v1098_v9  ;;  %v1117_v26 = vmul.f32 1.442695, %v1099_v15  ;;  %v1105_v40 = vsub.f32 %v715_v46, %v2802_v37 }
 0x184   : > { %v1119_v18 = vmul.f32 1.442695, %v1100_v13  ;;  %v1121_v30 = vmul.f32 1.442695, %v1101_v23  ;;  %v1123_v31 = vmul.f32 1.442695, %v1102_v8  ;;  %v1106_v59 = vsub.f32 %v2756_v2, %v2802_v37 }
 0x185   : > { %1841 = vpow2.f32 %v1113_v21  ;;  %v1125_v17 = vmul.f32 1.442695, %v1103_v22  ;;  %v1127_v25 = vmul.f32 1.442695, %v1104_v27  ;;  %v1107_v32 = vsub.f32 %v2769_v51, %v2802_v37 }
 0x186   : > { %1843 = vpow2.f32 %v1115_v20  ;;  %v1129_v9 = vmul.f32 1.442695, %v1105_v40  ;;  %v1108_v46 = vsub.f32 %v2776_v52, %v2802_v37  ;;  %v1131_v21 = vmul.f32 1.442695, %v1106_v59 }
 0x187   : > { %1845 = vpow2.f32 %v1117_v26  ;;  %v1109_v2 = vsub.f32 %v2781_v36, %v2802_v37  ;;  %v1133_v26 = vmul.f32 1.442695, %v1107_v32  ;;  %v1110_v22 = vsub.f32 %v2761_v42, %v2802_v37 }
 0x188   : > { %1847 = vpow2.f32 %v1119_v18  ;;  %v2222_v18 = vmov 0   ;;  %v1112_v40 = vsub.f32 %v2792_v3, %v2802_v37 }
 0x189   : > { %1849 = vpow2.f32 %v1121_v30  ;;  %1838 = vset.pattern.permute.xlu1 %v2222_v18  ;;  %1839 = vset.pattern.permute.xlu2 %v2222_v18  ;;  %v1135_v30 = vmul.f32 1.442695, %v1108_v46  ;;  %v1137_v36 = vmul.f32 1.442695, %v1109_v2  ;;  %v2844_v2 = vld [vmem:[#allocation2 + $0x40] sm:$0xff] }
 0x18a   : > { %1851 = vpow2.f32 %v1123_v31  ;;  %1840 = vset.pattern.permute.xlu0 %v2222_v18  ;;  %v1111_v31 = vsub.f32 %v2785_v44, %v2802_v37  ;;  %v2834_v44 = vld [vmem:[#allocation2] sm:$0xff] }
 0x18b   : > { %v1842_v35 = vpop.eup %1841  ;;  %1853 = vpow2.f32 %v1125_v17  ;;  %v1139_v17 = vmul.f32 1.442695, %v1110_v22 }
 0x18c   : > { %v1844_v38 = vpop.eup %1843  ;;  %1855 = vpow2.f32 %v1127_v25  ;;  %v1141_v42 = vmul.f32 1.442695, %v1111_v31  ;;  %v2966_v31 = vld [vmem:[#allocation2 + $0x38] sm:$0xff] }
 0x18d   : > { %v1145_v45 = vadd.f32 %v1844_v38, %v1842_v35  ;;  %v1846_v19 = vpop.eup %1845  ;;  %1857 = vpow2.f32 %v1129_v9 }
 0x18e   : > { %v1848_v60 = vpop.eup %1847  ;;  %1859 = vpow2.f32 %v1131_v21 }
 0x18f   : > { %v1146_v4 = vadd.f32 %v1846_v19, %v1145_v45  ;;  %v1850_v13 = vpop.eup %1849  ;;  %1861 = vpow2.f32 %v1133_v26 }
 0x190   : > { %v1852_v23 = vpop.eup %1851  ;;  %1863 = vpow2.f32 %v1135_v30 }
 0x191   : > { %v1147_v15 = vadd.f32 %v1848_v60, %v1146_v4  ;;  %v1854_v51 = vpop.eup %1853  ;;  %1865 = vpow2.f32 %v1137_v36  ;;  %v1143_v4 = vmul.f32 1.442695, %v1112_v40 }
 0x192   : > { %v1856_v27 = vpop.eup %1855  ;;  %1867 = vpow2.f32 %v1139_v17  ;;  %v2864_v17 = vld [vmem:[#allocation2 + $0x10] sm:$0xff] }
 0x193   : > { %v1148_v20 = vadd.f32 %v1850_v13, %v1147_v15  ;;  %v1858_v38 = vpop.eup %1857  ;;  %1869 = vpow2.f32 %v1141_v42 }
 0x194   : > { %v1860_v19 = vpop.eup %1859  ;;  %1871 = vpow2.f32 %v1143_v4 }
 0x195   : > { %v1149_v8 = vadd.f32 %v1852_v23, %v1148_v20  ;;  %v1862_v25 = vpop.eup %1861 }
 0x196   : > { %v1864_v32 = vpop.eup %1863 }
 0x197   : > { %v1150_v52 = vadd.f32 %v1854_v51, %v1149_v8  ;;  %v1866_v15 = vpop.eup %1865  ;;  %v2846_v51 = vld [vmem:[#allocation2 + $0x8] sm:$0xff] }
 0x198   : > { %v1868_v46 = vpop.eup %1867 }
 0x199   : > { %v1151_v35 = vadd.f32 %v1856_v27, %v1150_v52  ;;  %v1870_v23 = vpop.eup %1869 }
 0x19a   : > { %v1872_v8 = vpop.eup %1871 }
 0x19b   : > { %v1152_v45 = vadd.f32 %v1858_v38, %v1151_v35 }
 0x19d   : > { %v1153_v59 = vadd.f32 %v1860_v19, %v1152_v45  ;;  %v2866_v45 = vld [vmem:[#allocation2 + $0x48] sm:$0xff] }
 0x19f   : > { %v1154_v60 = vadd.f32 %v1862_v25, %v1153_v59 }
 0x1a1   : > { %v1155_v9 = vadd.f32 %v1864_v32, %v1154_v60 }
 0x1a3   : > { %v1156_v37 = vadd.f32 %v1866_v15, %v1155_v9 }
 0x1a4   : > { %v724_v3 = vpop.xlane.xlu0 %723 }
 0x1a5   : > { %v2837_v13 = vmax.f32 %v2834_v44, %v724_v3  ;;  %v1157_v21 = vadd.f32 %v1868_v46, %v1156_v37  ;;  %v2884_v3 = vld [vmem:[#allocation2 + $0x50] sm:$0xff] }
 0x1a7   : > { %1060 = vst.msk [vmem:[#allocation2] sm:$0xff] %vm1043_vm1, %v2837_v13  ;;  %869 = vperm.xlu1 %1838, %v2837_v13   ;;  %v1158_v26 = vadd.f32 %v1870_v23, %v1157_v21  ;;  %v2895_v23 = vld [vmem:[#allocation2 + $0x58] sm:$0xff] }
 0x1a9   : > { %v1159_v22 = vadd.f32 %v1872_v8, %v1158_v26  ;;  %v2897_v8 = vld [vmem:[#allocation2 + $0x18] sm:$0xff] }
 0x1aa   : > { %v740_v18 = vpop.xlane.xlu2 %739 }
 0x1ab   : > { %v2849_v30 = vmax.f32 %v2844_v2, %v740_v18  ;;  %v1160_v27 = vrot.slane %v1159_v22, 4 }
 0x1ac   : > { %v726_v52 = vpop.xlane.xlu0 %725 }
 0x1ad   : > { %1068 = vst.msk [vmem:[#allocation2 + $0x40] sm:$0xff] %vm1043_vm1, %v2849_v30  ;;  %v2856_v36 = vmax.f32 %v2846_v51, %v726_v52  ;;  %v1161_v35 = vadd.f32 %v1160_v27, %v1159_v22 }
 0x1af   : > { %1061 = vst.msk [vmem:[#allocation2 + $0x8] sm:$0xff] %vm1043_vm1, %v2856_v36  ;;  %909 = vperm.xlu1 %1838, %v2849_v30   ;;  %874 = vperm.xlu2 %1839, %v2856_v36   ;;  %v1162_v40 = vrot.slane %v1161_v35, 2 }
 0x1b1   : > { %v1163_v19 = vadd.f32 %v1162_v40, %v1161_v35  ;;  %v2915_v40 = vld [vmem:[#allocation2 + $0x20] sm:$0xff] }
 0x1b3   : > { %v1164_v25 = vrot.slane %v1163_v19, 1 }
 0x1b4   : > { %v728_v42 = vpop.xlane.xlu1 %727  ;;  %v742_v59 = vpop.xlane.xlu0 %741 }
 0x1b5   : > { %v2869_v4 = vmax.f32 %v2864_v17, %v728_v42  ;;  %v2872_v60 = vmax.f32 %v2866_v45, %v742_v59  ;;  %v1165_v32 = vadd.f32 %v1164_v25, %v1163_v19  ;;  %v2917_v19 = vld [vmem:[#allocation2 + $0x60] sm:$0xff] }
 0x1b7   : > { %1062 = vst.msk [vmem:[#allocation2 + $0x10] sm:$0xff] %vm1043_vm1, %v2869_v4  ;;  %914 = vperm.xlu0 %1840, %v2872_v60  }
 0x1b8   : > { %1069 = vst.msk [vmem:[#allocation2 + $0x48] sm:$0xff] %vm1043_vm1, %v2872_v60 }
 0x1b9   : > { %1167 = vst [vmem:[%s2416_s29] sm:$0x1] %v1165_v32 }
 0x1bc   : > { %v744_v37 = vpop.xlane.xlu1 %743 }
 0x1bd   : > { %v2887_v46 = vmax.f32 %v2884_v3, %v744_v37  ;;  %v2939_v37 = vld [vmem:[#allocation2 + $0x30] sm:$0xff] }
 0x1bf   : > { %1070 = vst.msk [vmem:[#allocation2 + $0x50] sm:$0xff] %vm1043_vm1, %v2887_v46  ;;  %919 = vperm.xlu2 %1839, %v2887_v46   ;;  %879 = vperm.xlu0 %1840, %v2869_v4  }
 0x1c2   : > { %v746_v26 = vpop.xlane.xlu2 %745 }
 0x1c3   : > { %v2900_v18 = vmax.f32 %v2895_v23, %v746_v26 }
 0x1c4   : > { %v730_v22 = vpop.xlane.xlu1 %729 }
 0x1c5   : > { %1071 = vst.msk [vmem:[#allocation2 + $0x58] sm:$0xff] %vm1043_vm1, %v2900_v18  ;;  %v2907_v27 = vmax.f32 %v2897_v8, %v730_v22  ;;  %924 = vperm.xlu1 %1838, %v2900_v18   ;;  %v2935_v22 = vld [vmem:[#allocation2 + $0x28] sm:$0xff] }
 0x1c7   : > { %1063 = vst.msk [vmem:[#allocation2 + $0x18] sm:$0xff] %vm1043_vm1, %v2907_v27  ;;  %884 = vperm.xlu2 %1839, %v2907_v27  }
 0x1ca   : > { %v732_v42 = vpop.xlane.xlu2 %731  ;;  %v748_v59 = vpop.xlane.xlu0 %747 }
 0x1cb   : > { %v2920_v25 = vmax.f32 %v2915_v40, %v732_v42  ;;  %v2923_v32 = vmax.f32 %v2917_v19, %v748_v59  ;;  %v2937_v42 = vld [vmem:[#allocation2 + $0x68] sm:$0xff] }
 0x1cd   : > { %1064 = vst.msk [vmem:[#allocation2 + $0x20] sm:$0xff] %vm1043_vm1, %v2920_v25  ;;  %889 = vperm.xlu1 %1838, %v2920_v25   ;;  %929 = vperm.xlu0 %1840, %v2923_v32  }
 0x1ce   : > { %1072 = vst.msk [vmem:[#allocation2 + $0x60] sm:$0xff] %vm1043_vm1, %v2923_v32 }
 0x1d2   : > { %v734_v59 = vpop.xlane.xlu2 %733  ;;  %v750_v52 = vpop.xlane.xlu1 %749 }
 0x1d3   : > { %v2942_v9 = vmax.f32 %v2935_v22, %v734_v59  ;;  %v2945_v26 = vmax.f32 %v2937_v42, %v750_v52  ;;  %v2964_v59 = vld [vmem:[#allocation2 + $0x70] sm:$0xff] }
 0x1d4   : > { %v736_v35 = vpop.xlane.xlu0 %735 }
 0x1d5   : > { %1065 = vst.msk [vmem:[#allocation2 + $0x28] sm:$0xff] %vm1043_vm1, %v2942_v9  ;;  %v2954_v21 = vmax.f32 %v2939_v37, %v736_v35  ;;  %894 = vperm.xlu2 %1839, %v2942_v9  }
 0x1d6   : > { %1073 = vst.msk [vmem:[#allocation2 + $0x68] sm:$0xff] %vm1043_vm1, %v2945_v26 }
 0x1d7   : > { %1066 = vst.msk [vmem:[#allocation2 + $0x30] sm:$0xff] %vm1043_vm1, %v2954_v21  ;;  %899 = vperm.xlu1 %1838, %v2954_v21  }
 0x1da   : > { %v752_v15 = vpop.xlane.xlu2 %751 }
 0x1db   : > { %v2969_v35 = vmax.f32 %v2964_v59, %v752_v15  ;;  %v2984_v15 = vld [vmem:[#allocation2 + $0x78] sm:$0xff] }
 0x1dc   : > { %v738_v20 = vpop.xlane.xlu1 %737 }
 0x1dd   : > { %1074 = vst.msk [vmem:[#allocation2 + $0x70] sm:$0xff] %vm1043_vm1, %v2969_v35  ;;  %v2976_v52 = vmax.f32 %v2966_v31, %v738_v20  ;;  %934 = vperm.xlu2 %1839, %v2945_v26  }
 0x1df   : > { %1067 = vst.msk [vmem:[#allocation2 + $0x38] sm:$0xff] %vm1043_vm1, %v2976_v52  ;;  %939 = vperm.xlu1 %1838, %v2969_v35  }
 0x1e2   : > { %v754_v11 = vpop.xlane.xlu0 %753 }
 0x1e3   : > { %v2987_v38 = vmax.f32 %v2984_v15, %v754_v11 }
 0x1e5   : > { %1075 = vst.msk [vmem:[#allocation2 + $0x78] sm:$0xff] %vm1043_vm1, %v2987_v38  ;;  %904 = vperm.xlu2 %1839, %v2976_v52   ;;  %944 = vperm.xlu0 %1840, %v2987_v38  }
 0x209   : > { %v875_v10 = vpop.permute.xlu2 %874 }
 0x20a   : > { %v948_v1 = vsub.f32 %v2546_v49, %v875_v10 }
 0x20c   : > { %v965_v62 = vmul.f32 1.442695, %v948_v1 }
 0x20e   : > { %1873 = vpow2.f32 %v965_v62 }
 0x214   : > { %v1874_v39 = vpop.eup %1873 }
 0x215   : > { %997 = vadd.xlane.f32.xlu1 %v1874_v39 }
 0x219   : > { %v870_v33 = vpop.permute.xlu1 %869  ;;  %v920_v11 = vpop.permute.xlu2 %919 }
 0x21a   : > { %v947_v28 = vsub.f32 %v2530_v41, %v870_v33  ;;  %v957_v20 = vsub.f32 %v2570_v63, %v920_v11 }
 0x21c   : > { %v963_v5 = vmul.f32 1.442695, %v947_v28  ;;  %v983_v61 = vmul.f32 1.442695, %v957_v20 }
 0x21e   : > { %1875 = vpow2.f32 %v963_v5 }
 0x21f   : > { %1877 = vpow2.f32 %v983_v61 }
 0x221   : > { %v910_v43 = vpop.permute.xlu1 %909  ;;  %v885_v50 = vpop.permute.xlu2 %884 }
 0x222   : > { %v955_v58 = vsub.f32 %v2540_v48, %v910_v43  ;;  %v950_v62 = vsub.f32 %v2586_v7, %v885_v50 }
 0x224   : > { %v1876_v34 = vpop.eup %1875  ;;  %v979_v49 = vmul.f32 1.442695, %v955_v58  ;;  %v969_v39 = vmul.f32 1.442695, %v950_v62 }
 0x225   : > { %v1878_v1 = vpop.eup %1877  ;;  %995 = vadd.xlane.f32.xlu2 %v1876_v34 }
 0x226   : > { %1879 = vpow2.f32 %v979_v49  ;;  %1015 = vadd.xlane.f32.xlu1 %v1878_v1 }
 0x227   : > { %1881 = vpow2.f32 %v969_v39 }
 0x229   : > { %v915_v41 = vpop.permute.xlu0 %914 }
 0x22a   : > { %v956_v63 = vsub.f32 %v2561_v57, %v915_v41 }
 0x22c   : > { %v1880_v28 = vpop.eup %1879  ;;  %v981_v33 = vmul.f32 1.442695, %v956_v63 }
 0x22d   : > { %1011 = vadd.xlane.f32.xlu2 %v1880_v28  ;;  %v1882_v58 = vpop.eup %1881 }
 0x22e   : > { %1883 = vpow2.f32 %v981_v33 }
 0x22f   : > { %v895_v61 = vpop.permute.xlu2 %894 }
 0x230   : > { %v952_v20 = vsub.f32 %v2651_v53, %v895_v61 }
 0x231   : > { %v880_v48 = vpop.permute.xlu0 %879 }
 0x232   : > { %v949_v43 = vsub.f32 %v2556_v56, %v880_v48  ;;  %v973_v49 = vmul.f32 1.442695, %v952_v20 }
 0x234   : > { %v1884_v5 = vpop.eup %1883  ;;  %v967_v10 = vmul.f32 1.442695, %v949_v43 }
 0x235   : > { %1001 = vadd.xlane.f32.xlu2 %v1882_v58  ;;  %1013 = vadd.xlane.f32.xlu0 %v1884_v5 }
 0x236   : > { %1885 = vpow2.f32 %v967_v10 }
 0x237   : > { %v925_v7 = vpop.permute.xlu1 %924  ;;  %v935_v34 = vpop.permute.xlu2 %934 }
 0x238   : > { %v958_v50 = vsub.f32 %v2580_v6, %v925_v7 }
 0x23a   : > { %v985_v57 = vmul.f32 1.442695, %v958_v50 }
 0x23c   : > { %v1886_v11 = vpop.eup %1885  ;;  %1887 = vpow2.f32 %v985_v57 }
 0x23d   : > { %999 = vadd.xlane.f32.xlu0 %v1886_v11  ;;  %1889 = vpow2.f32 %v973_v49 }
 0x23f   : > { %v890_v1 = vpop.permute.xlu1 %889  ;;  %v930_v62 = vpop.permute.xlu0 %929 }
 0x240   : > { %v951_v56 = vsub.f32 %v2599_v14, %v890_v1  ;;  %v905_v39 = vpop.permute.xlu2 %904  ;;  %v959_v41 = vsub.f32 %v2604_v16, %v930_v62  ;;  %v960_v16 = vsub.f32 %v2656_v54, %v935_v34 }
 0x241   : > { %v954_v6 = vsub.f32 %v2745_v55, %v905_v39  ;;  %v788_v39 = vld [vmem:[#allocation3 + $0x8] sm:$0xff] }
 0x242   : > { %v1888_v63 = vpop.eup %1887  ;;  %v971_v28 = vmul.f32 1.442695, %v951_v56  ;;  %v987_v33 = vmul.f32 1.442695, %v959_v41  ;;  %v989_v10 = vmul.f32 1.442695, %v960_v16 }
 0x243   : > { %1017 = vadd.xlane.f32.xlu2 %v1888_v63  ;;  %v977_v53 = vmul.f32 1.442695, %v954_v6  ;;  %v1890_v61 = vpop.eup %1889  ;;  %v3297_v6 = vsub.f32 %v2884_v3, %v2887_v46  ;;  %v3299_v3 = vsub.f32 %v2866_v45, %v2872_v60  ;;  %v3301_v45 = vsub.f32 %v2864_v17, %v2869_v4  ;;  %v789_v4 = vld [vmem:[#allocation3 + $0x10] sm:$0xff] }
 0x244   : > { %1891 = vpow2.f32 %v971_v28 }
 0x245   : > { %1893 = vpow2.f32 %v987_v33  ;;  %v837_v46 = vmul.f32 1.442695, %v3299_v3  ;;  %v823_v60 = vmul.f32 1.442695, %v3301_v45  ;;  %v793_v45 = vld [vmem:[#allocation3 + $0x30] sm:$0xff] }
 0x246   : > { %1895 = vpow2.f32 %v977_v53  ;;  %v839_v53 = vmul.f32 1.442695, %v3297_v6 }
 0x249   : > { %v900_v48 = vpop.permute.xlu1 %899 }
 0x24a   : > { %v1892_v43 = vpop.eup %1891  ;;  %v953_v58 = vsub.f32 %v2675_v0, %v900_v48  ;;  %v787_v48 = vld [vmem:[#allocation3] sm:$0xff] }
 0x24b   : > { %1005 = vadd.xlane.f32.xlu2 %v1890_v61  ;;  %1003 = vadd.xlane.f32.xlu1 %v1892_v43  ;;  %v1894_v14 = vpop.eup %1893 }
 0x24c   : > { %v975_v5 = vmul.f32 1.442695, %v953_v58  ;;  %1019 = vadd.xlane.f32.xlu0 %v1894_v14  ;;  %v1896_v50 = vpop.eup %1895  ;;  %v797_v58 = vld [vmem:[#allocation3 + $0x50] sm:$0xff] }
 0x24e   : > { %1897 = vpow2.f32 %v975_v5 }
 0x24f   : > { %1899 = vpow2.f32 %v989_v10  ;;  %v3300_v10 = vsub.f32 %v2897_v8, %v2907_v27  ;;  %v790_v27 = vld [vmem:[#allocation3 + $0x18] sm:$0xff] }
 0x251   : > { %v940_v7 = vpop.permute.xlu1 %939 }
 0x252   : > { %v961_v55 = vsub.f32 %v2725_v47, %v940_v7  ;;  %v3295_v47 = vsub.f32 %v2846_v51, %v2856_v36  ;;  %v3298_v51 = vsub.f32 %v2844_v2, %v2849_v30  ;;  %v825_v7 = vmul.f32 1.442695, %v3300_v10 }
 0x253   : > { %1009 = vadd.xlane.f32.xlu1 %v1896_v50  ;;  %v795_v50 = vld [vmem:[#allocation3 + $0x40] sm:$0xff] }
 0x254   : > { %v1898_v57 = vpop.eup %1897  ;;  %v991_v20 = vmul.f32 1.442695, %v961_v55  ;;  %v821_v56 = vmul.f32 1.442695, %v3295_v47  ;;  %v835_v36 = vmul.f32 1.442695, %v3298_v51 }
 0x255   : > { %1007 = vadd.xlane.f32.xlu0 %v1898_v57  ;;  %v1900_v49 = vpop.eup %1899 }
 0x256   : > { %1901 = vpow2.f32 %v991_v20 }
 0x257   : > { %v945_v0 = vpop.permute.xlu0 %944 }
 0x258   : > { %v962_v11 = vsub.f32 %v2796_v12, %v945_v0  ;;  %v3296_v12 = vsub.f32 %v2834_v44, %v2837_v13 }
 0x25a   : > { %v993_v54 = vmul.f32 1.442695, %v962_v11  ;;  %v819_v33 = vmul.f32 1.442695, %v3296_v12  ;;  %v796_v11 = vld [vmem:[#allocation3 + $0x48] sm:$0xff] }
 0x25b   : > { %1021 = vadd.xlane.f32.xlu1 %v1900_v49 }
 0x25c   : > { %v1902_v34 = vpop.eup %1901  ;;  %1903 = vpow2.f32 %v993_v54 }
 0x25d   : > { %1023 = vadd.xlane.f32.xlu2 %v1902_v34  ;;  %1905 = vpow2.f32 %v821_v56  ;;  %v3302_v34 = vsub.f32 %v2895_v23, %v2900_v18  ;;  %v3304_v23 = vsub.f32 %v2935_v22, %v2942_v9  ;;  %v3306_v9 = vsub.f32 %v2966_v31, %v2976_v52 }
 0x25e   : > { %1907 = vpow2.f32 %v819_v33 }
 0x25f   : > { %1909 = vpow2.f32 %v839_v53  ;;  %v829_v18 = vmul.f32 1.442695, %v3304_v23  ;;  %v3305_v53 = vsub.f32 %v2917_v19, %v2923_v32  ;;  %v833_v22 = vmul.f32 1.442695, %v3306_v9 }
 0x260   : > { %1911 = vpow2.f32 %v835_v36  ;;  %v798_v36 = vld [vmem:[#allocation3 + $0x58] sm:$0xff]  ;;  %v3307_v19 = vsub.f32 %v2939_v37, %v2954_v21 }
 0x261   : > { %1913 = vpow2.f32 %v837_v46  ;;  %v843_v51 = vmul.f32 1.442695, %v3305_v53 }
 0x262   : > { %v1904_v1 = vpop.eup %1903  ;;  %1915 = vpow2.f32 %v825_v7  ;;  %v831_v32 = vmul.f32 1.442695, %v3307_v19  ;;  %v3308_v7 = vsub.f32 %v2937_v42, %v2945_v26 }
 0x263   : > { %1025 = vadd.xlane.f32.xlu0 %v1904_v1  ;;  %v1906_v62 = vpop.eup %1905  ;;  %1917 = vpow2.f32 %v823_v60  ;;  %v841_v1 = vmul.f32 1.442695, %v3302_v34  ;;  %v801_v34 = vld [vmem:[#allocation3 + $0x70] sm:$0xff] }
 0x264   : > { %v852_v41 = vmul.f32 %v1906_v62, %v788_v39  ;;  %v1908_v61 = vpop.eup %1907 }
 0x265   : > { %v1910_v43 = vpop.eup %1909  ;;  %v851_v14 = vmul.f32 %v1908_v61, %v787_v48  ;;  %1919 = vpow2.f32 %v841_v1 }
 0x266   : > { %v861_v13 = vmul.f32 %v1910_v43, %v797_v58  ;;  %v1912_v30 = vpop.eup %1911  ;;  %v792_v58 = vld [vmem:[#allocation3 + $0x28] sm:$0xff] }
 0x267   : > { %v859_v55 = vmul.f32 %v1912_v30, %v795_v50  ;;  %v1914_v0 = vpop.eup %1913  ;;  %v3309_v50 = vsub.f32 %v2964_v59, %v2969_v35 }
 0x268   : > { %v1916_v8 = vpop.eup %1915  ;;  %v860_v54 = vmul.f32 %v1914_v0, %v796_v11 }
 0x269   : > { %v854_v49 = vmul.f32 %v1916_v8, %v790_v27  ;;  %v1918_v17 = vpop.eup %1917  ;;  %v3310_v8 = vsub.f32 %v2984_v15, %v2987_v38 }
 0x26b   : > { %v1920_v6 = vpop.eup %1919  ;;  %v849_v27 = vmul.f32 1.442695, %v3310_v8 }
 0x26c   : > { %v862_v61 = vmul.f32 %v1920_v6, %v798_v36 }
 0x288   : > { %v998_v63 = vpop.xlane.xlu1 %997 }
 0x289   : > { %v1028_v28 = vadd.f32 %v998_v63, %v852_v41  ;;  %v3303_v41 = vsub.f32 %v2915_v40, %v2920_v25 }
 0x28b   : > { %1045 = vst.msk [vmem:[#allocation3 + $0x8] sm:$0xff] %vm1043_vm1, %v1028_v28  ;;  %v827_v63 = vmul.f32 1.442695, %v3303_v41  ;;  %v853_v28 = vmul.f32 %v1918_v17, %v789_v4  ;;  %v802_v17 = vld [vmem:[#allocation3 + $0x78] sm:$0xff] }
 0x28d   : > { %1921 = vpow2.f32 %v827_v63 }
 0x28e   : > { %1923 = vpow2.f32 %v829_v18 }
 0x28f   : > { %1925 = vpow2.f32 %v843_v51 }
 0x290   : > { %1927 = vpow2.f32 %v833_v22 }
 0x291   : > { %1929 = vpow2.f32 %v831_v32 }
 0x293   : > { %v1922_v48 = vpop.eup %1921 }
 0x294   : > { %v1924_v43 = vpop.eup %1923 }
 0x295   : > { %v856_v3 = vmul.f32 %v1924_v43, %v792_v58 }
 0x298   : > { %v996_v44 = vpop.xlane.xlu2 %995 }
 0x299   : > { %v1027_v16 = vadd.f32 %v996_v44, %v851_v14  ;;  %v1016_v5 = vpop.xlane.xlu1 %1015  ;;  %v791_v14 = vld [vmem:[#allocation3 + $0x20] sm:$0xff]  ;;  %v1926_v44 = vpop.eup %1925 }
 0x29a   : > { %v1037_v2 = vadd.f32 %v1016_v5, %v861_v13  ;;  %v799_v13 = vld [vmem:[#allocation3 + $0x60] sm:$0xff]  ;;  %v855_v46 = vmul.f32 %v1922_v48, %v791_v14  ;;  %v1928_v37 = vpop.eup %1927 }
 0x29b   : > { %1044 = vst.msk [vmem:[#allocation3] sm:$0xff] %vm1043_vm1, %v1027_v16  ;;  %v863_v10 = vmul.f32 %v1926_v44, %v799_v13 }
 0x29c   : > { %1054 = vst.msk [vmem:[#allocation3 + $0x50] sm:$0xff] %vm1043_vm1, %v1037_v2  ;;  %v845_v2 = vmul.f32 1.442695, %v3308_v7 }
 0x29e   : > { %1931 = vpow2.f32 %v845_v2 }
 0x2a0   : > { %v1012_v57 = vpop.xlane.xlu2 %1011 }
 0x2a1   : > { %v1035_v20 = vadd.f32 %v1012_v57, %v859_v55  ;;  %v847_v55 = vmul.f32 1.442695, %v3309_v50  ;;  %v794_v57 = vld [vmem:[#allocation3 + $0x38] sm:$0xff] }
 0x2a2   : > { %v858_v60 = vmul.f32 %v1928_v37, %v794_v57 }
 0x2a3   : > { %1052 = vst.msk [vmem:[#allocation3 + $0x40] sm:$0xff] %vm1043_vm1, %v1035_v20  ;;  %v1930_v20 = vpop.eup %1929  ;;  %1933 = vpow2.f32 %v847_v55 }
 0x2a4   : > { %v857_v0 = vmul.f32 %v1930_v20, %v793_v45  ;;  %v1932_v35 = vpop.eup %1931  ;;  %1935 = vpow2.f32 %v849_v27 }
 0x2a8   : > { %v1002_v47 = vpop.xlane.xlu2 %1001  ;;  %v1014_v56 = vpop.xlane.xlu0 %1013 }
 0x2a9   : > { %v1030_v62 = vadd.f32 %v1002_v47, %v854_v49  ;;  %v1036_v39 = vadd.f32 %v1014_v56, %v860_v54  ;;  %v800_v49 = vld [vmem:[#allocation3 + $0x68] sm:$0xff]  ;;  %v1934_v54 = vpop.eup %1933 }
 0x2aa   : > { %v864_v1 = vmul.f32 %v1932_v35, %v800_v49  ;;  %v1936_v15 = vpop.eup %1935 }
 0x2ab   : > { %1047 = vst.msk [vmem:[#allocation3 + $0x18] sm:$0xff] %vm1043_vm1, %v1030_v62  ;;  %v865_v62 = vmul.f32 %v1934_v54, %v801_v34  ;;  %v866_v4 = vmul.f32 %v1936_v15, %v802_v17 }
 0x2ac   : > { %1053 = vst.msk [vmem:[#allocation3 + $0x48] sm:$0xff] %vm1043_vm1, %v1036_v39 }
 0x2b0   : > { %v1000_v12 = vpop.xlane.xlu0 %999 }
 0x2b1   : > { %v1029_v33 = vadd.f32 %v1000_v12, %v853_v28 }
 0x2b3   : > { %1046 = vst.msk [vmem:[#allocation3 + $0x10] sm:$0xff] %vm1043_vm1, %v1029_v33 }
 0x2b6   : > { %v1018_v40 = vpop.xlane.xlu2 %1017 }
 0x2b7   : > { %v1038_v25 = vadd.f32 %v1018_v40, %v862_v61 }
 0x2b9   : > { %1055 = vst.msk [vmem:[#allocation3 + $0x58] sm:$0xff] %vm1043_vm1, %v1038_v25 }
 0x2be   : > { %v1006_v16 = vpop.xlane.xlu2 %1005  ;;  %v1004_v5 = vpop.xlane.xlu1 %1003 }
 0x2bf   : > { %v1032_v31 = vadd.f32 %v1006_v16, %v856_v3  ;;  %v1031_v52 = vadd.f32 %v1004_v5, %v855_v46  ;;  %v1020_v30 = vpop.xlane.xlu0 %1019 }
 0x2c0   : > { %v1039_v21 = vadd.f32 %v1020_v30, %v863_v10 }
 0x2c1   : > { %1049 = vst.msk [vmem:[#allocation3 + $0x28] sm:$0xff] %vm1043_vm1, %v1032_v31 }
 0x2c2   : > { %1048 = vst.msk [vmem:[#allocation3 + $0x20] sm:$0xff] %vm1043_vm1, %v1031_v52 }
 0x2c3   : > { %1056 = vst.msk [vmem:[#allocation3 + $0x60] sm:$0xff] %vm1043_vm1, %v1039_v21 }
 0x2c6   : > { %v1010_v26 = vpop.xlane.xlu1 %1009 }
 0x2c7   : > { %v1034_v42 = vadd.f32 %v1010_v26, %v858_v60 }
 0x2c8   : > { %v1008_v11 = vpop.xlane.xlu0 %1007 }
 0x2c9   : > { %1051 = vst.msk [vmem:[#allocation3 + $0x38] sm:$0xff] %vm1043_vm1, %v1034_v42  ;;  %v1033_v59 = vadd.f32 %v1008_v11, %v857_v0 }
 0x2cb   : > { %1050 = vst.msk [vmem:[#allocation3 + $0x30] sm:$0xff] %vm1043_vm1, %v1033_v59 }
 0x2ce   : > { %v1022_v47 = vpop.xlane.xlu1 %1021 }
 0x2cf   : > { %v1040_v56 = vadd.f32 %v1022_v47, %v864_v1 }
 0x2d0   : > { %v1024_v39 = vpop.xlane.xlu2 %1023 }
 0x2d1   : > { %1057 = vst.msk [vmem:[#allocation3 + $0x68] sm:$0xff] %vm1043_vm1, %v1040_v56  ;;  %v1041_v38 = vadd.f32 %v1024_v39, %v865_v62 }
 0x2d3   : > { %1058 = vst.msk [vmem:[#allocation3 + $0x70] sm:$0xff] %vm1043_vm1, %v1041_v38 }
 0x2d5   : > { %1171 = sbr.rel (%p1652_p1) target bundleno = 956 (0x3bc), region = 44 }
 0x2d6   : > { %v1026_v41 = vpop.xlane.xlu0 %1025 }
 0x2d7   : > { %v1042_v63 = vadd.f32 %v1026_v41, %v866_v4 }
 0x2d9   : > { %1059 = vst.msk [vmem:[#allocation3 + $0x78] sm:$0xff] %vm1043_vm1, %v1042_v63 }
 0x2da   : > { %v1188_v28 = vld [vmem:[#allocation3] sm:$0xff]  ;;  %v1189_v23 = vld [vmem:[#allocation3 + $0x8] sm:$0xff]  ;;  %v1190_v18 = vld [vmem:[#allocation3 + $0x10] sm:$0xff] }
 0x2db   : > { %v1191_v12 = vld [vmem:[#allocation3 + $0x18] sm:$0xff]  ;;  %1937 = vlog2.f32 %v1188_v28  ;;  %v1192_v33 = vld [vmem:[#allocation3 + $0x20] sm:$0xff]  ;;  %v1193_v6 = vld [vmem:[#allocation3 + $0x28] sm:$0xff] }
 0x2dc   : > { %1939 = vlog2.f32 %v1189_v23  ;;  %v1194_v53 = vld [vmem:[#allocation3 + $0x30] sm:$0xff]  ;;  %v1195_v51 = vld [vmem:[#allocation3 + $0x38] sm:$0xff]  ;;  %v1172_v61 = vld [vmem:[#allocation2] sm:$0xff] }
 0x2dd   : > { %1941 = vlog2.f32 %v1190_v18  ;;  %v1196_v40 = vld [vmem:[#allocation3 + $0x40] sm:$0xff]  ;;  %v1173_v9 = vld [vmem:[#allocation2 + $0x8] sm:$0xff]  ;;  %v1174_v58 = vld [vmem:[#allocation2 + $0x10] sm:$0xff] }
 0x2de   : > { %1943 = vlog2.f32 %v1191_v12  ;;  %v1197_v43 = vld [vmem:[#allocation3 + $0x48] sm:$0xff]  ;;  %v1198_v3 = vld [vmem:[#allocation3 + $0x50] sm:$0xff]  ;;  %v1175_v31 = vld [vmem:[#allocation2 + $0x18] sm:$0xff] }
 0x2df   : > { %1945 = vlog2.f32 %v1192_v33  ;;  %v1176_v7 = vld [vmem:[#allocation2 + $0x20] sm:$0xff]  ;;  %v1199_v2 = vld [vmem:[#allocation3 + $0x58] sm:$0xff]  ;;  %v1177_v50 = vld [vmem:[#allocation2 + $0x28] sm:$0xff] }
 0x2e0   : > { %1947 = vlog2.f32 %v1193_v6  ;;  %v1200_v57 = vld [vmem:[#allocation3 + $0x60] sm:$0xff]  ;;  %v1178_v42 = vld [vmem:[#allocation2 + $0x30] sm:$0xff]  ;;  %v1201_v8 = vld [vmem:[#allocation3 + $0x68] sm:$0xff] }
 0x2e1   : > { %v1938_v36 = vpop.eup %1937  ;;  %1949 = vlog2.f32 %v1194_v53  ;;  %v1179_v54 = vld [vmem:[#allocation2 + $0x38] sm:$0xff]  ;;  %v1202_v1 = vld [vmem:[#allocation3 + $0x70] sm:$0xff]  ;;  %v1180_v15 = vld [vmem:[#allocation2 + $0x40] sm:$0xff] }
 0x2e2   : > { %v1940_v25 = vpop.eup %1939  ;;  %v1205_v22 = vmul.f32 0.6931472, %v1938_v36  ;;  %1951 = vlog2.f32 %v1195_v51  ;;  %v1203_v63 = vld [vmem:[#allocation3 + $0x78] sm:$0xff]  ;;  %v1181_v53 = vld [vmem:[#allocation2 + $0x48] sm:$0xff]  ;;  %v1186_v59 = vld [vmem:[#allocation2 + $0x70] sm:$0xff] }
 0x2e3   : > { %v1942_v48 = vpop.eup %1941  ;;  %v1207_v19 = vmul.f32 0.6931472, %v1940_v25  ;;  %1953 = vlog2.f32 %v1196_v40 }
 0x2e4   : > { %v1944_v32 = vpop.eup %1943  ;;  %v1209_v14 = vmul.f32 0.6931472, %v1942_v48  ;;  %v1236_v44 = vadd.f32 %v1205_v22, %v1172_v61  ;;  %1955 = vlog2.f32 %v1197_v43  ;;  %v1182_v48 = vld [vmem:[#allocation2 + $0x50] sm:$0xff] }
 0x2e5   : > { %v1946_v13 = vpop.eup %1945  ;;  %v1211_v46 = vmul.f32 0.6931472, %v1944_v32  ;;  %v1237_v16 = vadd.f32 %v1207_v19, %v1173_v9  ;;  %1957 = vlog2.f32 %v1198_v3 }
 0x2e6   : > { %v1948_v5 = vpop.eup %1947  ;;  %v1213_v52 = vmul.f32 0.6931472, %v1946_v13  ;;  %v1238_v21 = vadd.f32 %v1209_v14, %v1174_v58  ;;  %v1252_v55 = vsel %vm641_vm2, %v1236_v44, 0.0  ;;  %1959 = vlog2.f32 %v1199_v2 }
 0x2e7   : > { %v1950_v10 = vpop.eup %1949  ;;  %v1215_v30 = vmul.f32 0.6931472, %v1948_v5  ;;  %v1239_v45 = vadd.f32 %v1211_v46, %v1175_v31  ;;  %v1253_v60 = vsel %vm642_vm4, %v1237_v16, 0.0  ;;  %v1268_v49 = vsel %vm1043_vm1, %v1252_v55, 0.0  ;;  %v1183_v46 = vld [vmem:[#allocation2 + $0x58] sm:$0xff]  ;;  %v3318_v55 = vld [vmem:[#allocation25_spill] sm:$0xff] }
 0x2e8   : > { %v1952_v37 = vpop.eup %1951  ;;  %v1217_v20 = vmul.f32 0.6931472, %v1950_v10  ;;  %v1240_v0 = vadd.f32 %v1213_v52, %v1176_v7  ;;  %v1254_v35 = vsel %vm643_vm7, %v1238_v21, 0.0  ;;  %1961 = vlog2.f32 %v1200_v57 }
 0x2e9   : > { %v1954_v26 = vpop.eup %1953  ;;  %v1219_v27 = vmul.f32 0.6931472, %v1952_v37  ;;  %v1241_v11 = vadd.f32 %v1215_v30, %v1177_v50  ;;  %v1269_v34 = vsel %vm1043_vm1, %v1253_v60, 0.0  ;;  %v1255_v62 = vsel %vm644_vm9, %v1239_v45, 0.0  ;;  %v1184_v30 = vld [vmem:[#allocation2 + $0x60] sm:$0xff]  ;;  %v1185_v60 = vld [vmem:[#allocation2 + $0x68] sm:$0xff] }
 0x2ea   : > { %v1956_v24 = vpop.eup %1955  ;;  %v1221_v29 = vmul.f32 0.6931472, %v1954_v26  ;;  %v1242_v47 = vadd.f32 %v1217_v20, %v1178_v42  ;;  %v1270_v39 = vadd.f32 %v1269_v34, %v1268_v49  ;;  %1963 = vlog2.f32 %v1201_v8 }
 0x2eb   : > { %v1958_v38 = vpop.eup %1957  ;;  %v1256_v4 = vsel %vm645_vm10, %v1240_v0, 0.0  ;;  %v1271_v41 = vsel %vm1043_vm1, %v1254_v35, 0.0  ;;  %v1223_v28 = vmul.f32 0.6931472, %v1956_v24  ;;  %v1243_v23 = vadd.f32 %v1219_v27, %v1179_v54 }
 0x2ec   : > { %v1257_v12 = vsel %vm646_vm5, %v1241_v11, 0.0  ;;  %v1272_v33 = vadd.f32 %v1271_v41, %v1270_v39  ;;  %v1960_v6 = vpop.eup %1959  ;;  %1965 = vlog2.f32 %v1202_v1  ;;  %v1273_v51 = vsel %vm1043_vm1, %v1255_v62, 0.0 }
 0x2ed   : > { %v1225_v36 = vmul.f32 0.6931472, %v1958_v38  ;;  %v1244_v61 = vadd.f32 %v1221_v29, %v1180_v15  ;;  %v1258_v25 = vsel %vm647_vm11, %v1242_v47, 0.0  ;;  %1967 = vlog2.f32 %v1203_v63  ;;  %v1187_v29 = vld [vmem:[#allocation2 + $0x78] sm:$0xff] }
 0x2ee   : > { %v1274_v9 = vadd.f32 %v1273_v51, %v1272_v33  ;;  %v1962_v22 = vpop.eup %1961  ;;  %v1275_v43 = vsel %vm1043_vm1, %v1256_v4, 0.0  ;;  %v1277_v19 = vsel %vm1043_vm1, %v1257_v12, 0.0  ;;  %v1227_v32 = vmul.f32 0.6931472, %v1960_v6 }
 0x2ef   : > { %v1245_v58 = vadd.f32 %v1223_v28, %v1181_v53  ;;  %v1259_v44 = vsel %vm648_vm14, %v1243_v23, 0.0  ;;  %v1279_v16 = vsel %vm1043_vm1, %v1258_v25, 0.0  ;;  %v1229_v5 = vmul.f32 0.6931472, %v1962_v22 }
 0x2f0   : > { %v1276_v13 = vadd.f32 %v1275_v43, %v1274_v9  ;;  %v1964_v3 = vpop.eup %1963  ;;  %v1246_v31 = vadd.f32 %v1225_v36, %v1182_v48  ;;  %v1260_v10 = vsel %vm649_vm3, %v1244_v61, 0.0  ;;  %v1281_v21 = vsel %vm1043_vm1, %v1259_v44, 0.0 }
 0x2f1   : > { %v1231_v37 = vmul.f32 0.6931472, %v1964_v3  ;;  %v1247_v50 = vadd.f32 %v1227_v32, %v1183_v46  ;;  %vm3319_vm2 = vcmp.lt.s32.totalorder %v3318_v55, 200  ;;  %v1283_v26 = vsel %vm1043_vm1, %v1260_v10, 0.0 }
 0x2f2   : > { %v1278_v7 = vadd.f32 %v1277_v19, %v1276_v13  ;;  %v1966_v2 = vpop.eup %1965  ;;  %v1261_v57 = vsel %vm3319_vm2, %v1245_v58, 0.0  ;;  %v1248_v0 = vadd.f32 %v1229_v5, %v1184_v30  ;;  %v1262_v27 = vsel %vm651_vm8, %v1246_v31, 0.0 }
 0x2f3   : > { %v1968_v45 = vpop.eup %1967  ;;  %v1233_v42 = vmul.f32 0.6931472, %v1966_v2  ;;  %v1285_v35 = vsel %vm1043_vm1, %v1261_v57, 0.0  ;;  %v1249_v24 = vadd.f32 %v1231_v37, %v1185_v60  ;;  %v1263_v34 = vsel %vm652_vm12, %v1247_v50, 0.0 }
 0x2f4   : > { %v1280_v20 = vadd.f32 %v1279_v16, %v1278_v7  ;;  %v1235_v49 = vmul.f32 0.6931472, %v1968_v45  ;;  %v1287_v47 = vsel %vm1043_vm1, %v1262_v27, 0.0  ;;  %v1264_v39 = vsel %vm653_vm13, %v1248_v0, 0.0 }
 0x2f5   : > { %v1250_v56 = vadd.f32 %v1233_v42, %v1186_v59  ;;  %v1289_v15 = vsel %vm1043_vm1, %v1263_v34, 0.0  ;;  %v1265_v41 = vsel %vm654_vm15, %v1249_v24, 0.0  ;;  %v1291_v28 = vsel %vm1043_vm1, %v1264_v39, 0.0 }
 0x2f6   : > { %v1282_v11 = vadd.f32 %v1281_v21, %v1280_v20  ;;  %v1251_v17 = vadd.f32 %v1235_v49, %v1187_v29  ;;  %v1293_v33 = vsel %vm1043_vm1, %v1265_v41, 0.0 }
 0x2f7   : > { %v1266_v18 = vsel %vm655_vm0, %v1250_v56, 0.0 }
 0x2f8   : > { %v1284_v1 = vadd.f32 %v1283_v26, %v1282_v11  ;;  %v1267_v53 = vsel %vm656_vm6, %v1251_v17, 0.0  ;;  %v1295_v36 = vsel %vm1043_vm1, %v1266_v18, 0.0 }
 0x2f9   : > { %v1297_v40 = vsel %vm1043_vm1, %v1267_v53, 0.0 }
 0x2fa   : > { %v1286_v38 = vadd.f32 %v1285_v35, %v1284_v1 }
 0x2fc   : > { %v1288_v63 = vadd.f32 %v1287_v47, %v1286_v38 }
 0x2fe   : > { %v1290_v12 = vadd.f32 %v1289_v15, %v1288_v63 }
 0x300   : > { %v1292_v51 = vadd.f32 %v1291_v28, %v1290_v12 }
 0x302   : > { %v1294_v61 = vadd.f32 %v1293_v33, %v1292_v51 }
 0x304   : > { %v1296_v25 = vadd.f32 %v1295_v36, %v1294_v61 }
 0x306   : > { %v1298_v9 = vadd.f32 %v1297_v40, %v1296_v25 }
 0x308   : > { %1299 = vadd.xlane.f32.xlu0 %v1298_v9 }
 0x37b   : > { %v1300_v22 = vpop.xlane.xlu0 %1299 }
 0x37c   : > { %v1301_v48 = vrot.slane %v1300_v22, 4 }
 0x37e   : > { %v1302_v43 = vadd.f32 %v1301_v48, %v1300_v22 }
 0x380   : > { %v1303_v19 = vrot.slane %v1302_v43, 2 }
 0x382   : > { %v1304_v32 = vadd.f32 %v1303_v19, %v1302_v43 }
 0x384   : > { %v1305_v58 = vrot.slane %v1304_v32, 1 }
 0x386   : > { %v1306_v14 = vadd.f32 %v1305_v58, %v1304_v32 }
 0x388   : > { %1708 = vpush %v1306_v14 }
 0x3b9   : > { %s1709_s7 = spop %1708 }
 0x3ba   : > { %v1308_v44 = vstv %s1709_s7 }
 0x3bb   : > { %1309 = vst [vmem:[%s254_s23] sm:$0x1] %v1308_v44 }
 0x3bc PF: > { %s1314_s10 = sand.u32 1, %s2302_s26   ;;  %s1653_s11 = sshll.u32 %s2203_s22, 1 }
 0x3bd   : > { %s3129_s12 = sadd.s32 %s2199_s21, %s1653_s11  ;;  %s3326_s1 = sld [smem:[#allocation41_spill]] }
 0x3be   : > { %s1344_s4 = sshll.u32 %s2414_s27, 4  ;;  %s3136_s28 = scalar_lea.sflag [#allocation11], %s1314_s10  ;;  %s1345_s4 = int_to_ptr.vmem [resolvable:$true] %s1344_s4 }
 0x3c3   : > { %s1342_s2 = scalar_lea.hbm %s3326_s1, %s3129_s12  ;;  %s2049_s7 = scalar_lea.hbm %s3326_s1, 4 }
 0x3c4   : > { %s1346_s3 = sshll.u32 %s1342_s2, 4  ;;  %s1347_s3 = int_to_ptr.hbm [resolvable:$true] %s1346_s3 }
 0x3c5   : > { %s2043_s9 = sshra.s32 %s1347_s3, 4  ;;  %s2044_s9 = int_to_ptr.hbm [resolvable:$true] %s2043_s9 }
 0x3c6   : > { %s2045_s6 = scalar_lea.hbm %s2044_s9, 1  ;;  %p2050_p13 = scmp.lt.s32.totalorder %s2044_s9, %s3326_s1 }
 0x3c7   : > { %p2046_p4 = scmp.ne.s32.totalorder %s2044_s9, %s2045_s6  ;;  %p2051_p0 = scmp.lt.s32.totalorder %s2049_s7, %s2045_s6 }
 0x3c9   : > { %p2047_p7 = pnand %p2046_p4, %p2326_p8  ;;  %p2052_p3 = por %p2051_p0, %p2050_p13 }
 0x3cb   : > { %p2048_p11 = pneg %p2047_p7 }
 0x3cd   : > { %p2053_p2 = pnand %p2052_p3, %p2048_p11 }
 0x3cf   : > { %2056 = shalt.err (!%p2053_p2)
}
 0x3d0   : > { %1717 = dma.vmem_to_hbm [thread:$0]  (%p2326_p8), %s1345_s4, 16, %s1347_s3, %s3136_s28  }
 0x3d1   : > { %s3328_s2 = sld [smem:[#allocation40_spill]]  ;;  %s1329_s26 = sshll.u32 %s254_s23, 4  ;;  %s1330_s26 = int_to_ptr.vmem [resolvable:$true] %s1329_s26 }
 0x3d2   : > { %s3329_s11 = sld [smem:[#allocation42_spill]]  ;;  %s1311_s0 = scalar_lea.sflag [#allocation6], %s2398_s18 }
 0x3d7   : > { %s1327_s21 = scalar_lea.hbm %s3328_s2, %s2203_s22  ;;  %s2077_s22 = scalar_lea.hbm %s3328_s2, 2 }
 0x3d8   : > { %s1331_s9 = sshll.u32 %s1327_s21, 4  ;;  %s1357_s13 = scalar_lea.hbm %s3329_s11, %s3129_s12  ;;  %s1332_s9 = int_to_ptr.hbm [resolvable:$true] %s1331_s9 }
 0x3d9   : > { %s2071_s1 = sshra.s32 %s1332_s9, 4  ;;  %s2072_s1 = int_to_ptr.hbm [resolvable:$true] %s2071_s1 }
 0x3da   : > { %s2073_s15 = scalar_lea.hbm %s2072_s1, 1  ;;  %p2078_p4 = scmp.lt.s32.totalorder %s2072_s1, %s3328_s2 }
 0x3db   : > { %p2074_p5 = scmp.ne.s32.totalorder %s2072_s1, %s2073_s15  ;;  %p2079_p7 = scmp.lt.s32.totalorder %s2077_s22, %s2073_s15 }
 0x3dd   : > { %p2075_p12 = pnand %p2074_p5, %p2361_p9  ;;  %p2080_p11 = por %p2079_p7, %p2078_p4 }
 0x3df   : > { %p2076_p1 = pneg %p2075_p12 }
 0x3e1   : > { %p2081_p13 = pnand %p2080_p11, %p2076_p1 }
 0x3e3   : > { %2084 = shalt.err (!%p2081_p13)
}
 0x3e4   : > { %1716 = dma.vmem_to_hbm [thread:$0]  (%p2361_p9), %s1330_s26, 16, %s1332_s9, %s1311_s0  }
 0x3e5   : > { %s1359_s18 = sshll.u32 %s2416_s29, 4  ;;  %s1361_s12 = sshll.u32 %s1357_s13, 4  ;;  %s1360_s18 = int_to_ptr.vmem [resolvable:$true] %s1359_s18  ;;  %s1362_s12 = int_to_ptr.hbm [resolvable:$true] %s1361_s12 }
 0x3e6   : > { %s2099_s8 = sshra.s32 %s1362_s12, 4  ;;  %s2105_s6 = scalar_lea.hbm %s3329_s11, 4  ;;  %s2100_s8 = int_to_ptr.hbm [resolvable:$true] %s2099_s8 }
 0x3e7   : > { %s2101_s21 = scalar_lea.hbm %s2100_s8, 1  ;;  %p2106_p5 = scmp.lt.s32.totalorder %s2100_s8, %s3329_s11 }
 0x3e8   : > { %p2102_p0 = scmp.ne.s32.totalorder %s2100_s8, %s2101_s21  ;;  %p2107_p9 = scmp.lt.s32.totalorder %s2105_s6, %s2101_s21 }
 0x3ea   : > { %p2103_p3 = pnand %p2102_p0, %p2326_p8  ;;  %p2108_p12 = por %p2107_p9, %p2106_p5 }
 0x3ec   : > { %p2104_p2 = pneg %p2103_p3 }
 0x3ee   : > { %p2109_p1 = pnand %p2108_p12, %p2104_p2 }
 0x3f0   : > { %2112 = shalt.err (!%p2109_p1)
}
 0x3f1   : > { %1718 = dma.vmem_to_hbm [thread:$0]  (%p2326_p8), %s1360_s18, 16, %s1362_s12, %s3136_s28  }
 0x3f2 PF: > { %s3330_s0 = sld [smem:[#allocation17_spill]]  ;;  %p1743_p4 = scmp.ge.s32.totalorder %s2215_s25, 2 }
 0x3f4   : > { %p1731_p7 = pnand %p1743_p4, %p2319_p6 }
 0x3f6   : > { %p1732_p11 = pneg %p1731_p7 }
 0x3f8   : > { %s1373_s26 = sand.u32 1, %s3330_s0  }
 0x3f9   : > { %s1374_s9 = scalar_lea.sflag [#allocation6], %s1373_s26 }
 0x3fa   : > { %2166 = dma.done.wait (%p1732_p11), %s1374_s9, 16  }
 0x3fb   : > { %2168 = vsyncadd (%p1732_p11), %s1374_s9, 4294967280  ;;  %s3332_s13 = sadd.s32 4294967294, %s2215_s25   ;;  %p1734_p13 = pnand %p1743_p4, %p2331_p10 }
 0x3fc   : > { %s1382_s3 = sand.u32 1, %s3332_s13  }
 0x3fd   : > { %p1735_p0 = pneg %p1734_p13  ;;  %s1383_s30 = scalar_lea.sflag [#allocation11], %s1382_s3 }
 0x3ff   : > { %2170 = dma.done.wait (%p1735_p0), %s1383_s30, 32  }
 0x400   : > { %2172 = vsyncadd (%p1735_p0), %s1383_s30, 4294967264  ;;  %s25_s25 = sadd.s32 1, %s2215_s25   ;;  %s3334_s21 = sld [smem:[#allocation18_spill]] }
 0x401   : > { %p22_p8 = scmp.ge.s32.totalorder %s25_s25, 6   ;;  %s3335_s23 = sld [smem:[#allocation21_spill]] }
 0x402   : > { %s3336_s28 = sld [smem:[#allocation23_spill]]  ;;  %s3337_s15 = smov %s2179_s16 }
 0x403   : > { %s3338_s16 = smov %s2183_s17  ;;  %s3339_s17 = smov %s2382_s14 }
 0x404   : > { %s3340_s18 = smov %s2191_s19  ;;  %s3341_s19 = smov %s2195_s20 }
 0x405   : > { %s3342_s20 = smov %s2379_s5  ;;  %s3343_s22 = smov %s2211_s24 }
 0x406   :  { %24 = sbr.rel (!%p22_p8) target bundleno = 18 (0x12), region = 118 }
 0x408   : > { %s3344_s24 = smov %s3336_s28 }
 0x40b   :  { %1397 = vsyncpa [#allocation5], 1 }
 0x40c   :  { %1399 = vsyncpa [#allocation5 + $0x1], 1 }
 0x40d   :  { %1400 = vsyncpa [#allocation8], 1 }
 0x40e   :  { %1401 = vsyncpa [#allocation6], 1 }
 0x40f   :  { %1403 = vsyncpa [#allocation6 + $0x1], 1 }
 0x410   :  { %1404 = vsyncpa [#allocation11], 1 }
 0x411   :  { %1406 = vsyncpa [#allocation11 + $0x1], 1 }

</bundles_post_ra>
